<compile_context>
chip_gen: v5e
topology: v5e:2x2
jax: 0.10.0
libtpu: 0.0.40
codegen_flags: <defaults>
</compile_context>

<pallas_src>
import functools

import jax
import jax.numpy as jnp
import numpy as np
from jax import lax
from jax.experimental import pallas as pl
from jax.experimental.pallas import tpu as pltpu

_HIGHEST = jax.lax.Precision.HIGHEST


# ----------------------------------------------------------------------------
# Fused kernel: all TemporalBlocks for one batch element (one grid step).
# ----------------------------------------------------------------------------
def _tcn_spp_kernel(*refs, levels, kernel_size, lp, pad_cols):
    """refs = [x_ref, <per-level params...>, <per-level outs...>, <scratch?>].

    levels[i] = dict(dilation, has_downsample, n_refs).  Per level the params are
    (w1_taps(k,Co,Ci), b1(Co,1), w2_taps(k,Co,Co), b2(Co,1)[, wd(Co,Ci), bd(Co,1)]).
    """
    n_levels = len(levels)
    n_param = sum(lv["n_refs"] for lv in levels)
    x_ref = refs[0]
    param_refs = refs[1:1 + n_param]
    out_refs = refs[1 + n_param:1 + n_param + n_levels]
    scratch_refs = refs[1 + n_param + n_levels:]
    k = kernel_size

    if k > 1:
        pad_scratch = scratch_refs[0]
        # Zero the causal-pad prefix once per grid step.  The activation region
        # is overwritten by every conv, so only the prefix must stay zero.
        pad_scratch[:, 0:pad_cols] = jnp.zeros(
            (pad_scratch.shape[0], pad_cols), jnp.float32)

    def causal_conv(act, w_ref, b_ref, dilation):
        # act: (C, Lp) f32; w_ref: (k, C_out, C); b_ref: (C_out, 1).
        # k weight-stationary matmuls accumulated in f32: no batched einsum, no
        # weight broadcast, no im2col slab, no per-conv zero-concat.
        c = act.shape[0]
        # tap j = k-1 has zero shift: use the live activation directly.
        acc = jnp.dot(w_ref[k - 1], act,
                      preferred_element_type=jnp.float32, precision=_HIGHEST)
        if k > 1:
            # Store the activation once at a lane-aligned offset; shifted taps
            # are static window loads that run over the zero prefix.
            pad_scratch[0:c, pad_cols:pad_cols + lp] = act
            for j in range(k - 1):
                s = (k - 1 - j) * dilation            # causal right-shift of tap j
                xj = pad_scratch[0:c, pad_cols - s:pad_cols - s + lp]
                acc = acc + jnp.dot(
                    w_ref[j], xj,
                    preferred_element_type=jnp.float32, precision=_HIGHEST)
        return acc + b_ref[...]

    a = x_ref[0].astype(jnp.float32)                  # (C0, Lp)
    p = 0
    for i, lv in enumerate(levels):
        d = lv["dilation"]
        w1, b1, w2, b2 = (param_refs[p], param_refs[p + 1],
                          param_refs[p + 2], param_refs[p + 3])
        p += 4

        # conv1 -> chomp -> ReLU -> (dropout = identity)
        h = jnp.maximum(causal_conv(a, w1, b1, d), 0.0)
        # conv2 -> chomp -> ReLU -> (dropout = identity)
        o = jnp.maximum(causal_conv(h, w2, b2, d), 0.0)

        # residual branch (1x1 downsample only when channel counts differ)
        if lv["has_downsample"]:
            wd, bd = param_refs[p], param_refs[p + 1]
            p += 2
            res = jnp.dot(wd[...], a, preferred_element_type=jnp.float32,
                          precision=_HIGHEST) + bd[...]
        else:
            res = a                                    # identity, exact f32

        out = jnp.maximum(o + res, 0.0)
        out_refs[i][0] = out                           # lane-dense (C_out, Lp) store
        a = out                                        # feeds next level (stays in VMEM)


# ----------------------------------------------------------------------------
# Wrapper: parameter prep, BlockSpecs, single fused pallas_call.
# ----------------------------------------------------------------------------
def temporal_conv_net_spp(x, all_params, *, kernel_size):
    """x: (N, C0, L) -> dict {0: x, 1: level1, ..., num_levels: levelN}."""
    assert kernel_size >= 1
    N, c0, L = x.shape
    x = x.astype(jnp.float32)

    # Lane-dense time axis: right-pad to a multiple of 128 (causal conv => the
    # pad columns never contaminate valid columns; sliced off after the call).
    Lp = ((L + 127) // 128) * 128
    xp = x if Lp == L else jnp.pad(x, ((0, 0), (0, 0), (0, Lp - L)))

    n_levels = len(all_params)
    max_pad = (kernel_size - 1) * (2 ** (n_levels - 1)) if n_levels else 0
    pad_cols = ((max_pad + 127) // 128) * 128 if max_pad > 0 else 0

    levels = []
    flat_inputs = [xp]
    in_specs = [pl.BlockSpec((1, c0, Lp), lambda b: (b, 0, 0))]
    out_shapes, out_specs = [], []

    def _full_spec(arr):          # whole (small) array resident in VMEM
        nd = arr.ndim
        return pl.BlockSpec(arr.shape, lambda b, _nd=nd: (0,) * _nd)

    c_in = c0
    chan = [c0]
    weight_bytes = 0
    for i, p in enumerate(all_params):
        c_out = p["w1"].shape[0]
        has_ds = (c_in != c_out)
        # PyTorch Conv1d weight (C_out, C_in, k) -> per-tap (k, C_out, C_in)
        w1 = jnp.transpose(p["w1"].astype(jnp.float32), (2, 0, 1))
        w2 = jnp.transpose(p["w2"].astype(jnp.float32), (2, 0, 1))
        lvl = [w1, p["b1"].astype(jnp.float32)[:, None],
               w2, p["b2"].astype(jnp.float32)[:, None]]
        if has_ds:
            lvl += [p["wd"].astype(jnp.float32),
                    p["bd"].astype(jnp.float32)[:, None]]
        levels.append(dict(dilation=2 ** i, has_downsample=has_ds,
                           n_refs=len(lvl)))
        flat_inputs += lvl
        in_specs += [_full_spec(a) for a in lvl]
        weight_bytes += sum(int(a.size) * 4 for a in lvl)
        out_shapes.append(jax.ShapeDtypeStruct((N, c_out, Lp), jnp.float32))
        out_specs.append(pl.BlockSpec((1, c_out, Lp), lambda b: (b, 0, 0)))
        chan.append(c_out)
        c_in = c_out

    c_max = max(chan)
    scratch_shapes = []
    scratch_bytes = 0
    if kernel_size > 1:
        scratch_shapes.append(pltpu.VMEM((c_max, pad_cols + Lp), jnp.float32))
        scratch_bytes = c_max * (pad_cols + Lp) * 4

    # VMEM budget: double-buffered input/output blocks + weights + scratch, with
    # headroom; clamp to 64 MiB so the same tiling fits v7x as well as v5e/v6e.
    block_bytes = 2 * c0 * Lp * 4 + sum(2 * c * Lp * 4 for c in chan[1:])
    est = block_bytes + 2 * weight_bytes + scratch_bytes
    vmem_limit = int(min(64 * 1024 * 1024, max(32 * 1024 * 1024, 4 * est)))

    kernel = functools.partial(_tcn_spp_kernel, levels=levels,
                               kernel_size=kernel_size, lp=Lp,
                               pad_cols=pad_cols)

    outs = pl.pallas_call(
        kernel,
        out_shape=tuple(out_shapes),
        grid_spec=pltpu.PrefetchScalarGridSpec(
            num_scalar_prefetch=0,
            grid=(N,),                         # >=2 steps: both v7x TCs get work
            in_specs=in_specs,
            out_specs=out_specs,
            scratch_shapes=scratch_shapes,
        ),
        compiler_params=pltpu.CompilerParams(
            dimension_semantics=("parallel",),
            vmem_limit_bytes=vmem_limit),
    )(*flat_inputs)

    out_dic = {0: x}
    for i, o in enumerate(outs):
        out_dic[i + 1] = o[:, :, :L] if Lp != L else o
    return out_dic


# ----------------------------------------------------------------------------
# Parameter construction (deterministic; weight_norm folded in here).
# ----------------------------------------------------------------------------
def _weight_norm_conv_weight(key_v, key_g, shape):
    v = 0.01 * jax.random.normal(key_v, shape, jnp.float32)
    norm = jnp.sqrt(jnp.sum(v * v, axis=(1, 2), keepdims=True)) + 1e-12
    g = jnp.abs(jax.random.normal(key_g, (shape[0], 1, 1), jnp.float32)) + 0.5
    return g * v / norm            # effective weight of weight_norm(Conv1d)


def make_block_params(key, c_in, c_out, k):
    ks = jax.random.split(key, 8)
    return {
        "w1": _weight_norm_conv_weight(ks[0], ks[1], (c_out, c_in, k)),
        "b1": 0.1 * jax.random.normal(ks[2], (c_out,), jnp.float32),
        "w2": _weight_norm_conv_weight(ks[3], ks[4], (c_out, c_out, k)),
        "b2": 0.1 * jax.random.normal(ks[5], (c_out,), jnp.float32),
        "wd": 0.01 * jax.random.normal(ks[6], (c_out, c_in), jnp.float32),
        "bd": 0.1 * jax.random.normal(ks[7], (c_out,), jnp.float32),
    }


# ----------------------------------------------------------------------------
# Pure-JAX reference (correctness check only).
# ----------------------------------------------------------------------------
def _ref_causal_conv(x, w, b, dilation, padding):
    y = lax.conv_general_dilated(
        x, w, window_strides=(1,), padding=[(padding, padding)],
        rhs_dilation=(dilation,), dimension_numbers=("NCH", "OIH", "NCH"),
        precision=_HIGHEST)
    y = y + b[None, :, None]
    if padding > 0:                 # Chomp1d (guarded for kernel_size == 1)
        y = y[:, :, :-padding]
    return y


def _ref_block(x, p, dilation, kernel_size):
    pad = (kernel_size - 1) * dilation
    h = jax.nn.relu(_ref_causal_conv(x, p["w1"], p["b1"], dilation, pad))
    o = jax.nn.relu(_ref_causal_conv(h, p["w2"], p["b2"], dilation, pad))
    c_in, c_out = x.shape[1], p["w1"].shape[0]
    if c_in != c_out:
        res = jnp.einsum("oc,ncl->nol", p["wd"], x,
                         precision=_HIGHEST) + p["bd"][None, :, None]
    else:
        res = x
    return jax.nn.relu(o + res)


def _ref_forward(x, all_params, kernel_size):
    outs = {0: x}
    for i, p in enumerate(all_params):
        outs[i + 1] = _ref_block(outs[i], p, 2 ** i, kernel_size)
    return outs


# ----------------------------------------------------------------------------
if __name__ == "__main__":
    key = jax.random.PRNGKey(0)
    k_x, k_p = jax.random.split(key)

    # small shapes consistent with the module: Conv1d inputs are (N, C, L)
    N, num_inputs, L = 2, 4, 16
    num_channels = [8, 8, 16]        # level 2 exercises the identity residual
    kernel_size = 2

    x = jax.random.normal(k_x, (N, num_inputs, L), jnp.float32)

    param_keys = jax.random.split(k_p, len(num_channels))
    all_params = []
    c_in = num_inputs
    for i, c_out in enumerate(num_channels):
        all_params.append(make_block_params(param_keys[i], c_in, c_out,
                                            kernel_size))
        c_in = c_out

    out_dic = temporal_conv_net_spp(x, all_params, kernel_size=kernel_size)
    jax.block_until_ready(out_dic[len(num_channels)])

    # Correctness check vs. a pure-JAX reference; both sides use f32 math with
    # HIGHEST precision, so a tight tolerance holds.
    ref_dic = _ref_forward(x, all_params, kernel_size)
    for i in range(len(num_channels) + 1):
        np.testing.assert_allclose(np.asarray(out_dic[i]),
                                   np.asarray(ref_dic[i]),
                                   rtol=2e-3, atol=2e-3)

    print("KERNEL_OK")
</pallas_src>

<mosaic_0001>
module attributes {stable_mosaic.version = 11 : i64} {
  func.func @_tcn_spp_kernel(%arg0: i32, %arg1: memref<1x4x128xf32, #tpu.memory_space<vmem>>, %arg2: memref<2x8x4xf32, #tpu.memory_space<vmem>>, %arg3: memref<8x1xf32, #tpu.memory_space<vmem>>, %arg4: memref<2x8x8xf32, #tpu.memory_space<vmem>>, %arg5: memref<8x1xf32, #tpu.memory_space<vmem>>, %arg6: memref<8x4xf32, #tpu.memory_space<vmem>>, %arg7: memref<8x1xf32, #tpu.memory_space<vmem>>, %arg8: memref<2x8x8xf32, #tpu.memory_space<vmem>>, %arg9: memref<8x1xf32, #tpu.memory_space<vmem>>, %arg10: memref<2x8x8xf32, #tpu.memory_space<vmem>>, %arg11: memref<8x1xf32, #tpu.memory_space<vmem>>, %arg12: memref<2x16x8xf32, #tpu.memory_space<vmem>>, %arg13: memref<16x1xf32, #tpu.memory_space<vmem>>, %arg14: memref<2x16x16xf32, #tpu.memory_space<vmem>>, %arg15: memref<16x1xf32, #tpu.memory_space<vmem>>, %arg16: memref<16x8xf32, #tpu.memory_space<vmem>>, %arg17: memref<16x1xf32, #tpu.memory_space<vmem>>, %arg18: memref<1x8x128xf32, #tpu.memory_space<vmem>>, %arg19: memref<1x8x128xf32, #tpu.memory_space<vmem>>, %arg20: memref<1x16x128xf32, #tpu.memory_space<vmem>>, %arg21: memref<16x256xf32, #tpu.memory_space<vmem>>) attributes {dimension_semantics = [#tpu.dimension_semantics<parallel>], iteration_bounds = array<i64: 2>, scalar_prefetch = 0 : i64, scratch_operands = 1 : i64, tpu.core_type = #tpu.core_type<tc>, window_params = [{transform_indices = @transform_0, window_bounds = array<i64: 1, 4, 128>}, {pipeline_mode = #tpu.pipeline_mode<synchronous>, transform_indices = @transform_1, window_bounds = array<i64: 2, 8, 4>}, {pipeline_mode = #tpu.pipeline_mode<synchronous>, transform_indices = @transform_2, window_bounds = array<i64: 8, 1>}, {pipeline_mode = #tpu.pipeline_mode<synchronous>, transform_indices = @transform_3, window_bounds = array<i64: 2, 8, 8>}, {pipeline_mode = #tpu.pipeline_mode<synchronous>, transform_indices = @transform_4, window_bounds = array<i64: 8, 1>}, {pipeline_mode = #tpu.pipeline_mode<synchronous>, transform_indices = @transform_5, window_bounds = array<i64: 8, 4>}, {pipeline_mode = #tpu.pipeline_mode<synchronous>, transform_indices = @transform_6, window_bounds = array<i64: 8, 1>}, {pipeline_mode = #tpu.pipeline_mode<synchronous>, transform_indices = @transform_7, window_bounds = array<i64: 2, 8, 8>}, {pipeline_mode = #tpu.pipeline_mode<synchronous>, transform_indices = @transform_8, window_bounds = array<i64: 8, 1>}, {pipeline_mode = #tpu.pipeline_mode<synchronous>, transform_indices = @transform_9, window_bounds = array<i64: 2, 8, 8>}, {pipeline_mode = #tpu.pipeline_mode<synchronous>, transform_indices = @transform_10, window_bounds = array<i64: 8, 1>}, {pipeline_mode = #tpu.pipeline_mode<synchronous>, transform_indices = @transform_11, window_bounds = array<i64: 2, 16, 8>}, {pipeline_mode = #tpu.pipeline_mode<synchronous>, transform_indices = @transform_12, window_bounds = array<i64: 16, 1>}, {pipeline_mode = #tpu.pipeline_mode<synchronous>, transform_indices = @transform_13, window_bounds = array<i64: 2, 16, 16>}, {pipeline_mode = #tpu.pipeline_mode<synchronous>, transform_indices = @transform_14, window_bounds = array<i64: 16, 1>}, {pipeline_mode = #tpu.pipeline_mode<synchronous>, transform_indices = @transform_15, window_bounds = array<i64: 16, 8>}, {pipeline_mode = #tpu.pipeline_mode<synchronous>, transform_indices = @transform_16, window_bounds = array<i64: 16, 1>}, {transform_indices = @transform_17, window_bounds = array<i64: 1, 8, 128>}, {transform_indices = @transform_18, window_bounds = array<i64: 1, 8, 128>}, {transform_indices = @transform_19, window_bounds = array<i64: 1, 16, 128>}]} {
    %cst = arith.constant 0.000000e+00 : f32
    %0 = vector.broadcast %cst : f32 to vector<16x128xf32>
    %c0 = arith.constant 0 : index
    %c0_0 = arith.constant 0 : index
    %1 = vector.load %arg21[%c0, %c0_0] : memref<16x256xf32, #tpu.memory_space<vmem>>, vector<16x128xf32>
    tpu.vector_store %arg21[%c0, %c0_0], %0 {strides = array<i32>} : memref<16x256xf32, #tpu.memory_space<vmem>>, vector<16x128xf32>,
    %c0_1 = arith.constant 0 : index
    %c0_2 = arith.constant 0 : index
    %c0_3 = arith.constant 0 : index
    %2 = vector.load %arg1[%c0_1, %c0_2, %c0_3] : memref<1x4x128xf32, #tpu.memory_space<vmem>>, vector<1x4x128xf32>
    %3 = vector.shape_cast %2 : vector<1x4x128xf32> to vector<4x128xf32>
    %c1 = arith.constant 1 : index
    %c0_4 = arith.constant 0 : index
    %c0_5 = arith.constant 0 : index
    %4 = vector.load %arg2[%c1, %c0_4, %c0_5] : memref<2x8x4xf32, #tpu.memory_space<vmem>>, vector<1x8x4xf32>
    %5 = vector.shape_cast %4 : vector<1x8x4xf32> to vector<8x4xf32>
    %cst_6 = arith.constant dense<0.000000e+00> : vector<8x128xf32>
    %6 = tpu.matmul %5, %3, %cst_6 {dimension_numbers = #tpu.dot_dimension_numbers<[1], [0], [0], [1], [0, 0, 1, 1], [], []>, precision = #tpu.contract_precision<fp32>} : vector<8x4xf32>, vector<4x128xf32>, vector<8x128xf32> -> vector<8x128xf32>
    %c0_7 = arith.constant 0 : index
    %c128 = arith.constant 128 : index
    %7 = vector.load %arg21[%c0_7, %c128] : memref<16x256xf32, #tpu.memory_space<vmem>>, vector<4x128xf32>
    tpu.vector_store %arg21[%c0_7, %c128], %3 {strides = array<i32>} : memref<16x256xf32, #tpu.memory_space<vmem>>, vector<4x128xf32>,
    %c0_8 = arith.constant 0 : index
    %c127 = arith.constant 127 : index
    %8 = vector.load %arg21[%c0_8, %c127] : memref<16x256xf32, #tpu.memory_space<vmem>>, vector<4x128xf32>
    %c0_9 = arith.constant 0 : index
    %c0_10 = arith.constant 0 : index
    %c0_11 = arith.constant 0 : index
    %9 = vector.load %arg2[%c0_9, %c0_10, %c0_11] : memref<2x8x4xf32, #tpu.memory_space<vmem>>, vector<1x8x4xf32>
    %10 = vector.shape_cast %9 : vector<1x8x4xf32> to vector<8x4xf32>
    %cst_12 = arith.constant dense<0.000000e+00> : vector<8x128xf32>
    %11 = tpu.matmul %10, %8, %cst_12 {dimension_numbers = #tpu.dot_dimension_numbers<[1], [0], [0], [1], [0, 0, 1, 1], [], []>, precision = #tpu.contract_precision<fp32>} : vector<8x4xf32>, vector<4x128xf32>, vector<8x128xf32> -> vector<8x128xf32>
    %12 = arith.addf %6, %11 : vector<8x128xf32>
    %c0_13 = arith.constant 0 : index
    %c0_14 = arith.constant 0 : index
    %13 = vector.load %arg3[%c0_13, %c0_14] : memref<8x1xf32, #tpu.memory_space<vmem>>, vector<8x1xf32>
    %14 = vector.broadcast %13 : vector<8x1xf32> to vector<8x128xf32>
    %15 = arith.addf %12, %14 : vector<8x128xf32>
    %cst_15 = arith.constant 0.000000e+00 : f32
    %16 = vector.broadcast %cst_15 : f32 to vector<8x128xf32>
    %17 = arith.maximumf %15, %16 : vector<8x128xf32>
    %c1_16 = arith.constant 1 : index
    %c0_17 = arith.constant 0 : index
    %c0_18 = arith.constant 0 : index
    %18 = vector.load %arg4[%c1_16, %c0_17, %c0_18] : memref<2x8x8xf32, #tpu.memory_space<vmem>>, vector<1x8x8xf32>
    %19 = vector.shape_cast %18 : vector<1x8x8xf32> to vector<8x8xf32>
    %cst_19 = arith.constant dense<0.000000e+00> : vector<8x128xf32>
    %20 = tpu.matmul %19, %17, %cst_19 {dimension_numbers = #tpu.dot_dimension_numbers<[1], [0], [0], [1], [0, 0, 1, 1], [], []>, precision = #tpu.contract_precision<fp32>} : vector<8x8xf32>, vector<8x128xf32>, vector<8x128xf32> -> vector<8x128xf32>
    %c0_20 = arith.constant 0 : index
    %c128_21 = arith.constant 128 : index
    %21 = vector.load %arg21[%c0_20, %c128_21] : memref<16x256xf32, #tpu.memory_space<vmem>>, vector<8x128xf32>
    tpu.vector_store %arg21[%c0_20, %c128_21], %17 {strides = array<i32>} : memref<16x256xf32, #tpu.memory_space<vmem>>, vector<8x128xf32>,
    %c0_22 = arith.constant 0 : index
    %c127_23 = arith.constant 127 : index
    %22 = vector.load %arg21[%c0_22, %c127_23] : memref<16x256xf32, #tpu.memory_space<vmem>>, vector<8x128xf32>
    %c0_24 = arith.constant 0 : index
    %c0_25 = arith.constant 0 : index
    %c0_26 = arith.constant 0 : index
    %23 = vector.load %arg4[%c0_24, %c0_25, %c0_26] : memref<2x8x8xf32, #tpu.memory_space<vmem>>, vector<1x8x8xf32>
    %24 = vector.shape_cast %23 : vector<1x8x8xf32> to vector<8x8xf32>
    %cst_27 = arith.constant dense<0.000000e+00> : vector<8x128xf32>
    %25 = tpu.matmul %24, %22, %cst_27 {dimension_numbers = #tpu.dot_dimension_numbers<[1], [0], [0], [1], [0, 0, 1, 1], [], []>, precision = #tpu.contract_precision<fp32>} : vector<8x8xf32>, vector<8x128xf32>, vector<8x128xf32> -> vector<8x128xf32>
    %26 = arith.addf %20, %25 : vector<8x128xf32>
    %c0_28 = arith.constant 0 : index
    %c0_29 = arith.constant 0 : index
    %27 = vector.load %arg5[%c0_28, %c0_29] : memref<8x1xf32, #tpu.memory_space<vmem>>, vector<8x1xf32>
    %28 = vector.broadcast %27 : vector<8x1xf32> to vector<8x128xf32>
    %29 = arith.addf %26, %28 : vector<8x128xf32>
    %cst_30 = arith.constant 0.000000e+00 : f32
    %30 = vector.broadcast %cst_30 : f32 to vector<8x128xf32>
    %31 = arith.maximumf %29, %30 : vector<8x128xf32>
    %c0_31 = arith.constant 0 : index
    %c0_32 = arith.constant 0 : index
    %32 = vector.load %arg6[%c0_31, %c0_32] : memref<8x4xf32, #tpu.memory_space<vmem>>, vector<8x4xf32>
    %cst_33 = arith.constant dense<0.000000e+00> : vector<8x128xf32>
    %33 = tpu.matmul %32, %3, %cst_33 {dimension_numbers = #tpu.dot_dimension_numbers<[1], [0], [0], [1], [0, 0, 1, 1], [], []>, precision = #tpu.contract_precision<fp32>} : vector<8x4xf32>, vector<4x128xf32>, vector<8x128xf32> -> vector<8x128xf32>
    %c0_34 = arith.constant 0 : index
    %c0_35 = arith.constant 0 : index
    %34 = vector.load %arg7[%c0_34, %c0_35] : memref<8x1xf32, #tpu.memory_space<vmem>>, vector<8x1xf32>
    %35 = vector.broadcast %34 : vector<8x1xf32> to vector<8x128xf32>
    %36 = arith.addf %33, %35 : vector<8x128xf32>
    %37 = arith.addf %31, %36 : vector<8x128xf32>
    %cst_36 = arith.constant 0.000000e+00 : f32
    %38 = vector.broadcast %cst_36 : f32 to vector<8x128xf32>
    %39 = arith.maximumf %37, %38 : vector<8x128xf32>
    %c0_37 = arith.constant 0 : index
    %c0_38 = arith.constant 0 : index
    %c0_39 = arith.constant 0 : index
    %40 = vector.load %arg18[%c0_37, %c0_38, %c0_39] : memref<1x8x128xf32, #tpu.memory_space<vmem>>, vector<1x8x128xf32>
    %41 = vector.shape_cast %40 : vector<1x8x128xf32> to vector<8x128xf32>
    %42 = vector.shape_cast %39 : vector<8x128xf32> to vector<1x8x128xf32>
    tpu.vector_store %arg18[%c0_37, %c0_38, %c0_39], %42 {strides = array<i32>} : memref<1x8x128xf32, #tpu.memory_space<vmem>>, vector<1x8x128xf32>,
    %c1_40 = arith.constant 1 : index
    %c0_41 = arith.constant 0 : index
    %c0_42 = arith.constant 0 : index
    %43 = vector.load %arg8[%c1_40, %c0_41, %c0_42] : memref<2x8x8xf32, #tpu.memory_space<vmem>>, vector<1x8x8xf32>
    %44 = vector.shape_cast %43 : vector<1x8x8xf32> to vector<8x8xf32>
    %cst_43 = arith.constant dense<0.000000e+00> : vector<8x128xf32>
    %45 = tpu.matmul %44, %39, %cst_43 {dimension_numbers = #tpu.dot_dimension_numbers<[1], [0], [0], [1], [0, 0, 1, 1], [], []>, precision = #tpu.contract_precision<fp32>} : vector<8x8xf32>, vector<8x128xf32>, vector<8x128xf32> -> vector<8x128xf32>
    %c0_44 = arith.constant 0 : index
    %c128_45 = arith.constant 128 : index
    %46 = vector.load %arg21[%c0_44, %c128_45] : memref<16x256xf32, #tpu.memory_space<vmem>>, vector<8x128xf32>
    tpu.vector_store %arg21[%c0_44, %c128_45], %39 {strides = array<i32>} : memref<16x256xf32, #tpu.memory_space<vmem>>, vector<8x128xf32>,
    %c0_46 = arith.constant 0 : index
    %c126 = arith.constant 126 : index
    %47 = vector.load %arg21[%c0_46, %c126] : memref<16x256xf32, #tpu.memory_space<vmem>>, vector<8x128xf32>
    %c0_47 = arith.constant 0 : index
    %c0_48 = arith.constant 0 : index
    %c0_49 = arith.constant 0 : index
    %48 = vector.load %arg8[%c0_47, %c0_48, %c0_49] : memref<2x8x8xf32, #tpu.memory_space<vmem>>, vector<1x8x8xf32>
    %49 = vector.shape_cast %48 : vector<1x8x8xf32> to vector<8x8xf32>
    %cst_50 = arith.constant dense<0.000000e+00> : vector<8x128xf32>
    %50 = tpu.matmul %49, %47, %cst_50 {dimension_numbers = #tpu.dot_dimension_numbers<[1], [0], [0], [1], [0, 0, 1, 1], [], []>, precision = #tpu.contract_precision<fp32>} : vector<8x8xf32>, vector<8x128xf32>, vector<8x128xf32> -> vector<8x128xf32>
    %51 = arith.addf %45, %50 : vector<8x128xf32>
    %c0_51 = arith.constant 0 : index
    %c0_52 = arith.constant 0 : index
    %52 = vector.load %arg9[%c0_51, %c0_52] : memref<8x1xf32, #tpu.memory_space<vmem>>, vector<8x1xf32>
    %53 = vector.broadcast %52 : vector<8x1xf32> to vector<8x128xf32>
    %54 = arith.addf %51, %53 : vector<8x128xf32>
    %cst_53 = arith.constant 0.000000e+00 : f32
    %55 = vector.broadcast %cst_53 : f32 to vector<8x128xf32>
    %56 = arith.maximumf %54, %55 : vector<8x128xf32>
    %c1_54 = arith.constant 1 : index
    %c0_55 = arith.constant 0 : index
    %c0_56 = arith.constant 0 : index
    %57 = vector.load %arg10[%c1_54, %c0_55, %c0_56] : memref<2x8x8xf32, #tpu.memory_space<vmem>>, vector<1x8x8xf32>
    %58 = vector.shape_cast %57 : vector<1x8x8xf32> to vector<8x8xf32>
    %cst_57 = arith.constant dense<0.000000e+00> : vector<8x128xf32>
    %59 = tpu.matmul %58, %56, %cst_57 {dimension_numbers = #tpu.dot_dimension_numbers<[1], [0], [0], [1], [0, 0, 1, 1], [], []>, precision = #tpu.contract_precision<fp32>} : vector<8x8xf32>, vector<8x128xf32>, vector<8x128xf32> -> vector<8x128xf32>
    %c0_58 = arith.constant 0 : index
    %c128_59 = arith.constant 128 : index
    %60 = vector.load %arg21[%c0_58, %c128_59] : memref<16x256xf32, #tpu.memory_space<vmem>>, vector<8x128xf32>
    tpu.vector_store %arg21[%c0_58, %c128_59], %56 {strides = array<i32>} : memref<16x256xf32, #tpu.memory_space<vmem>>, vector<8x128xf32>,
    %c0_60 = arith.constant 0 : index
    %c126_61 = arith.constant 126 : index
    %61 = vector.load %arg21[%c0_60, %c126_61] : memref<16x256xf32, #tpu.memory_space<vmem>>, vector<8x128xf32>
    %c0_62 = arith.constant 0 : index
    %c0_63 = arith.constant 0 : index
    %c0_64 = arith.constant 0 : index
    %62 = vector.load %arg10[%c0_62, %c0_63, %c0_64] : memref<2x8x8xf32, #tpu.memory_space<vmem>>, vector<1x8x8xf32>
    %63 = vector.shape_cast %62 : vector<1x8x8xf32> to vector<8x8xf32>
    %cst_65 = arith.constant dense<0.000000e+00> : vector<8x128xf32>
    %64 = tpu.matmul %63, %61, %cst_65 {dimension_numbers = #tpu.dot_dimension_numbers<[1], [0], [0], [1], [0, 0, 1, 1], [], []>, precision = #tpu.contract_precision<fp32>} : vector<8x8xf32>, vector<8x128xf32>, vector<8x128xf32> -> vector<8x128xf32>
    %65 = arith.addf %59, %64 : vector<8x128xf32>
    %c0_66 = arith.constant 0 : index
    %c0_67 = arith.constant 0 : index
    %66 = vector.load %arg11[%c0_66, %c0_67] : memref<8x1xf32, #tpu.memory_space<vmem>>, vector<8x1xf32>
    %67 = vector.broadcast %66 : vector<8x1xf32> to vector<8x128xf32>
    %68 = arith.addf %65, %67 : vector<8x128xf32>
    %cst_68 = arith.constant 0.000000e+00 : f32
    %69 = vector.broadcast %cst_68 : f32 to vector<8x128xf32>
    %70 = arith.maximumf %68, %69 : vector<8x128xf32>
    %71 = arith.addf %70, %39 : vector<8x128xf32>
    %cst_69 = arith.constant 0.000000e+00 : f32
    %72 = vector.broadcast %cst_69 : f32 to vector<8x128xf32>
    %73 = arith.maximumf %71, %72 : vector<8x128xf32>
    %c0_70 = arith.constant 0 : index
    %c0_71 = arith.constant 0 : index
    %c0_72 = arith.constant 0 : index
    %74 = vector.load %arg19[%c0_70, %c0_71, %c0_72] : memref<1x8x128xf32, #tpu.memory_space<vmem>>, vector<1x8x128xf32>
    %75 = vector.shape_cast %74 : vector<1x8x128xf32> to vector<8x128xf32>
    %76 = vector.shape_cast %73 : vector<8x128xf32> to vector<1x8x128xf32>
    tpu.vector_store %arg19[%c0_70, %c0_71, %c0_72], %76 {strides = array<i32>} : memref<1x8x128xf32, #tpu.memory_space<vmem>>, vector<1x8x128xf32>,
    %c1_73 = arith.constant 1 : index
    %c0_74 = arith.constant 0 : index
    %c0_75 = arith.constant 0 : index
    %77 = vector.load %arg12[%c1_73, %c0_74, %c0_75] : memref<2x16x8xf32, #tpu.memory_space<vmem>>, vector<1x16x8xf32>
    %78 = vector.shape_cast %77 : vector<1x16x8xf32> to vector<16x8xf32>
    %cst_76 = arith.constant dense<0.000000e+00> : vector<16x128xf32>
    %79 = tpu.matmul %78, %73, %cst_76 {dimension_numbers = #tpu.dot_dimension_numbers<[1], [0], [0], [1], [0, 0, 1, 1], [], []>, precision = #tpu.contract_precision<fp32>} : vector<16x8xf32>, vector<8x128xf32>, vector<16x128xf32> -> vector<16x128xf32>
    %c0_77 = arith.constant 0 : index
    %c128_78 = arith.constant 128 : index
    %80 = vector.load %arg21[%c0_77, %c128_78] : memref<16x256xf32, #tpu.memory_space<vmem>>, vector<8x128xf32>
    tpu.vector_store %arg21[%c0_77, %c128_78], %73 {strides = array<i32>} : memref<16x256xf32, #tpu.memory_space<vmem>>, vector<8x128xf32>,
    %c0_79 = arith.constant 0 : index
    %c124 = arith.constant 124 : index
    %81 = vector.load %arg21[%c0_79, %c124] : memref<16x256xf32, #tpu.memory_space<vmem>>, vector<8x128xf32>
    %c0_80 = arith.constant 0 : index
    %c0_81 = arith.constant 0 : index
    %c0_82 = arith.constant 0 : index
    %82 = vector.load %arg12[%c0_80, %c0_81, %c0_82] : memref<2x16x8xf32, #tpu.memory_space<vmem>>, vector<1x16x8xf32>
    %83 = vector.shape_cast %82 : vector<1x16x8xf32> to vector<16x8xf32>
    %cst_83 = arith.constant dense<0.000000e+00> : vector<16x128xf32>
    %84 = tpu.matmul %83, %81, %cst_83 {dimension_numbers = #tpu.dot_dimension_numbers<[1], [0], [0], [1], [0, 0, 1, 1], [], []>, precision = #tpu.contract_precision<fp32>} : vector<16x8xf32>, vector<8x128xf32>, vector<16x128xf32> -> vector<16x128xf32>
    %85 = arith.addf %79, %84 : vector<16x128xf32>
    %c0_84 = arith.constant 0 : index
    %c0_85 = arith.constant 0 : index
    %86 = vector.load %arg13[%c0_84, %c0_85] : memref<16x1xf32, #tpu.memory_space<vmem>>, vector<16x1xf32>
    %87 = vector.broadcast %86 : vector<16x1xf32> to vector<16x128xf32>
    %88 = arith.addf %85, %87 : vector<16x128xf32>
    %cst_86 = arith.constant 0.000000e+00 : f32
    %89 = vector.broadcast %cst_86 : f32 to vector<16x128xf32>
    %90 = arith.maximumf %88, %89 : vector<16x128xf32>
    %c1_87 = arith.constant 1 : index
    %c0_88 = arith.constant 0 : index
    %c0_89 = arith.constant 0 : index
    %91 = vector.load %arg14[%c1_87, %c0_88, %c0_89] : memref<2x16x16xf32, #tpu.memory_space<vmem>>, vector<1x16x16xf32>
    %92 = vector.shape_cast %91 : vector<1x16x16xf32> to vector<16x16xf32>
    %cst_90 = arith.constant dense<0.000000e+00> : vector<16x128xf32>
    %93 = tpu.matmul %92, %90, %cst_90 {dimension_numbers = #tpu.dot_dimension_numbers<[1], [0], [0], [1], [0, 0, 1, 1], [], []>, precision = #tpu.contract_precision<fp32>} : vector<16x16xf32>, vector<16x128xf32>, vector<16x128xf32> -> vector<16x128xf32>
    %c0_91 = arith.constant 0 : index
    %c128_92 = arith.constant 128 : index
    %94 = vector.load %arg21[%c0_91, %c128_92] : memref<16x256xf32, #tpu.memory_space<vmem>>, vector<16x128xf32>
    tpu.vector_store %arg21[%c0_91, %c128_92], %90 {strides = array<i32>} : memref<16x256xf32, #tpu.memory_space<vmem>>, vector<16x128xf32>,
    %c0_93 = arith.constant 0 : index
    %c124_94 = arith.constant 124 : index
    %95 = vector.load %arg21[%c0_93, %c124_94] : memref<16x256xf32, #tpu.memory_space<vmem>>, vector<16x128xf32>
    %c0_95 = arith.constant 0 : index
    %c0_96 = arith.constant 0 : index
    %c0_97 = arith.constant 0 : index
    %96 = vector.load %arg14[%c0_95, %c0_96, %c0_97] : memref<2x16x16xf32, #tpu.memory_space<vmem>>, vector<1x16x16xf32>
    %97 = vector.shape_cast %96 : vector<1x16x16xf32> to vector<16x16xf32>
    %cst_98 = arith.constant dense<0.000000e+00> : vector<16x128xf32>
    %98 = tpu.matmul %97, %95, %cst_98 {dimension_numbers = #tpu.dot_dimension_numbers<[1], [0], [0], [1], [0, 0, 1, 1], [], []>, precision = #tpu.contract_precision<fp32>} : vector<16x16xf32>, vector<16x128xf32>, vector<16x128xf32> -> vector<16x128xf32>
    %99 = arith.addf %93, %98 : vector<16x128xf32>
    %c0_99 = arith.constant 0 : index
    %c0_100 = arith.constant 0 : index
    %100 = vector.load %arg15[%c0_99, %c0_100] : memref<16x1xf32, #tpu.memory_space<vmem>>, vector<16x1xf32>
    %101 = vector.broadcast %100 : vector<16x1xf32> to vector<16x128xf32>
    %102 = arith.addf %99, %101 : vector<16x128xf32>
    %cst_101 = arith.constant 0.000000e+00 : f32
    %103 = vector.broadcast %cst_101 : f32 to vector<16x128xf32>
    %104 = arith.maximumf %102, %103 : vector<16x128xf32>
    %c0_102 = arith.constant 0 : index
    %c0_103 = arith.constant 0 : index
    %105 = vector.load %arg16[%c0_102, %c0_103] : memref<16x8xf32, #tpu.memory_space<vmem>>, vector<16x8xf32>
    %cst_104 = arith.constant dense<0.000000e+00> : vector<16x128xf32>
    %106 = tpu.matmul %105, %73, %cst_104 {dimension_numbers = #tpu.dot_dimension_numbers<[1], [0], [0], [1], [0, 0, 1, 1], [], []>, precision = #tpu.contract_precision<fp32>} : vector<16x8xf32>, vector<8x128xf32>, vector<16x128xf32> -> vector<16x128xf32>
    %c0_105 = arith.constant 0 : index
    %c0_106 = arith.constant 0 : index
    %107 = vector.load %arg17[%c0_105, %c0_106] : memref<16x1xf32, #tpu.memory_space<vmem>>, vector<16x1xf32>
    %108 = vector.broadcast %107 : vector<16x1xf32> to vector<16x128xf32>
    %109 = arith.addf %106, %108 : vector<16x128xf32>
    %110 = arith.addf %104, %109 : vector<16x128xf32>
    %cst_107 = arith.constant 0.000000e+00 : f32
    %111 = vector.broadcast %cst_107 : f32 to vector<16x128xf32>
    %112 = arith.maximumf %110, %111 : vector<16x128xf32>
    %c0_108 = arith.constant 0 : index
    %c0_109 = arith.constant 0 : index
    %c0_110 = arith.constant 0 : index
    %113 = vector.load %arg20[%c0_108, %c0_109, %c0_110] : memref<1x16x128xf32, #tpu.memory_space<vmem>>, vector<1x16x128xf32>
    %114 = vector.shape_cast %113 : vector<1x16x128xf32> to vector<16x128xf32>
    %115 = vector.shape_cast %112 : vector<16x128xf32> to vector<1x16x128xf32>
    tpu.vector_store %arg20[%c0_108, %c0_109, %c0_110], %115 {strides = array<i32>} : memref<1x16x128xf32, #tpu.memory_space<vmem>>, vector<1x16x128xf32>,
    return
  }
  func.func @transform_0(%arg0: i32) -> (i32, i32, i32) {
    %c0_i32 = arith.constant 0 : i32
    %c0_i32_0 = arith.constant 0 : i32
    %c0_i32_1 = arith.constant 0 : i32
    return %arg0, %c0_i32, %c0_i32_0 : i32, i32, i32
  }
  func.func @transform_1(%arg0: i32) -> (i32, i32, i32) {
    %c0_i32 = arith.constant 0 : i32
    %c0_i32_0 = arith.constant 0 : i32
    %c0_i32_1 = arith.constant 0 : i32
    %c0_i32_2 = arith.constant 0 : i32
    return %c0_i32, %c0_i32_0, %c0_i32_1 : i32, i32, i32
  }
  func.func @transform_2(%arg0: i32) -> (i32, i32) {
    %c0_i32 = arith.constant 0 : i32
    %c0_i32_0 = arith.constant 0 : i32
    %c0_i32_1 = arith.constant 0 : i32
    return %c0_i32, %c0_i32_0 : i32, i32
  }
  func.func @transform_3(%arg0: i32) -> (i32, i32, i32) {
    %c0_i32 = arith.constant 0 : i32
    %c0_i32_0 = arith.constant 0 : i32
    %c0_i32_1 = arith.constant 0 : i32
    %c0_i32_2 = arith.constant 0 : i32
    return %c0_i32, %c0_i32_0, %c0_i32_1 : i32, i32, i32
  }
  func.func @transform_4(%arg0: i32) -> (i32, i32) {
    %c0_i32 = arith.constant 0 : i32
    %c0_i32_0 = arith.constant 0 : i32
    %c0_i32_1 = arith.constant 0 : i32
    return %c0_i32, %c0_i32_0 : i32, i32
  }
  func.func @transform_5(%arg0: i32) -> (i32, i32) {
    %c0_i32 = arith.constant 0 : i32
    %c0_i32_0 = arith.constant 0 : i32
    %c0_i32_1 = arith.constant 0 : i32
    return %c0_i32, %c0_i32_0 : i32, i32
  }
  func.func @transform_6(%arg0: i32) -> (i32, i32) {
    %c0_i32 = arith.constant 0 : i32
    %c0_i32_0 = arith.constant 0 : i32
    %c0_i32_1 = arith.constant 0 : i32
    return %c0_i32, %c0_i32_0 : i32, i32
  }
  func.func @transform_7(%arg0: i32) -> (i32, i32, i32) {
    %c0_i32 = arith.constant 0 : i32
    %c0_i32_0 = arith.constant 0 : i32
    %c0_i32_1 = arith.constant 0 : i32
    %c0_i32_2 = arith.constant 0 : i32
    return %c0_i32, %c0_i32_0, %c0_i32_1 : i32, i32, i32
  }
  func.func @transform_8(%arg0: i32) -> (i32, i32) {
    %c0_i32 = arith.constant 0 : i32
    %c0_i32_0 = arith.constant 0 : i32
    %c0_i32_1 = arith.constant 0 : i32
    return %c0_i32, %c0_i32_0 : i32, i32
  }
  func.func @transform_9(%arg0: i32) -> (i32, i32, i32) {
    %c0_i32 = arith.constant 0 : i32
    %c0_i32_0 = arith.constant 0 : i32
    %c0_i32_1 = arith.constant 0 : i32
    %c0_i32_2 = arith.constant 0 : i32
    return %c0_i32, %c0_i32_0, %c0_i32_1 : i32, i32, i32
  }
  func.func @transform_10(%arg0: i32) -> (i32, i32) {
    %c0_i32 = arith.constant 0 : i32
    %c0_i32_0 = arith.constant 0 : i32
    %c0_i32_1 = arith.constant 0 : i32
    return %c0_i32, %c0_i32_0 : i32, i32
  }
  func.func @transform_11(%arg0: i32) -> (i32, i32, i32) {
    %c0_i32 = arith.constant 0 : i32
    %c0_i32_0 = arith.constant 0 : i32
    %c0_i32_1 = arith.constant 0 : i32
    %c0_i32_2 = arith.constant 0 : i32
    return %c0_i32, %c0_i32_0, %c0_i32_1 : i32, i32, i32
  }
  func.func @transform_12(%arg0: i32) -> (i32, i32) {
    %c0_i32 = arith.constant 0 : i32
    %c0_i32_0 = arith.constant 0 : i32
    %c0_i32_1 = arith.constant 0 : i32
    return %c0_i32, %c0_i32_0 : i32, i32
  }
  func.func @transform_13(%arg0: i32) -> (i32, i32, i32) {
    %c0_i32 = arith.constant 0 : i32
    %c0_i32_0 = arith.constant 0 : i32
    %c0_i32_1 = arith.constant 0 : i32
    %c0_i32_2 = arith.constant 0 : i32
    return %c0_i32, %c0_i32_0, %c0_i32_1 : i32, i32, i32
  }
  func.func @transform_14(%arg0: i32) -> (i32, i32) {
    %c0_i32 = arith.constant 0 : i32
    %c0_i32_0 = arith.constant 0 : i32
    %c0_i32_1 = arith.constant 0 : i32
    return %c0_i32, %c0_i32_0 : i32, i32
  }
  func.func @transform_15(%arg0: i32) -> (i32, i32) {
    %c0_i32 = arith.constant 0 : i32
    %c0_i32_0 = arith.constant 0 : i32
    %c0_i32_1 = arith.constant 0 : i32
    return %c0_i32, %c0_i32_0 : i32, i32
  }
  func.func @transform_16(%arg0: i32) -> (i32, i32) {
    %c0_i32 = arith.constant 0 : i32
    %c0_i32_0 = arith.constant 0 : i32
    %c0_i32_1 = arith.constant 0 : i32
    return %c0_i32, %c0_i32_0 : i32, i32
  }
  func.func @transform_17(%arg0: i32) -> (i32, i32, i32) {
    %c0_i32 = arith.constant 0 : i32
    %c0_i32_0 = arith.constant 0 : i32
    %c0_i32_1 = arith.constant 0 : i32
    return %arg0, %c0_i32, %c0_i32_0 : i32, i32, i32
  }
  func.func @transform_18(%arg0: i32) -> (i32, i32, i32) {
    %c0_i32 = arith.constant 0 : i32
    %c0_i32_0 = arith.constant 0 : i32
    %c0_i32_1 = arith.constant 0 : i32
    return %arg0, %c0_i32, %c0_i32_0 : i32, i32, i32
  }
  func.func @transform_19(%arg0: i32) -> (i32, i32, i32) {
    %c0_i32 = arith.constant 0 : i32
    %c0_i32_0 = arith.constant 0 : i32
    %c0_i32_1 = arith.constant 0 : i32
    return %arg0, %c0_i32, %c0_i32_0 : i32, i32, i32
  }
}

</mosaic_0001>

<bundles_post_ra>
// kernel: tpu_custom_call.1
= control target key start
LH: loop header
LB: loop body
LE: loop exit
PB: predicated region body
PF: predicated region fallthrough
CT: control target
= control target key end

     0   :  { %s3967_s0 = inlined_call_operand.vmem [shape: f32[2,4,128], index: 0, kind: input, shape index: {}]   ;;  %s3968_s1 = inlined_call_operand.vmem [shape: f32[2,8,4], index: 1, kind: input, shape index: {}]   ;;  %s3969_s2 = inlined_call_operand.vmem [shape: f32[8,1], index: 2, kind: input, shape index: {}]   ;;  %s3970_s3 = inlined_call_operand.vmem [shape: f32[2,8,8], index: 3, kind: input, shape index: {}]   ;;  %s3971_s4 = inlined_call_operand.vmem [shape: f32[8,1], index: 4, kind: input, shape index: {}]   ;;  %s3972_s5 = inlined_call_operand.vmem [shape: f32[8,4], index: 5, kind: input, shape index: {}]   ;;  %s3973_s6 = inlined_call_operand.vmem [shape: f32[8,1], index: 6, kind: input, shape index: {}]   ;;  %s3974_s7 = inlined_call_operand.vmem [shape: f32[2,8,8], index: 7, kind: input, shape index: {}]   ;;  %s3975_s8 = inlined_call_operand.vmem [shape: f32[8,1], index: 8, kind: input, shape index: {}]   ;;  %s3976_s9 = inlined_call_operand.vmem [shape: f32[2,8,8], index: 9, kind: input, shape index: {}]   ;;  %s3977_s10 = inlined_call_operand.vmem [shape: f32[8,1], index: 10, kind: input, shape index: {}]   ;;  %s3978_s11 = inlined_call_operand.vmem [shape: f32[2,16,8], index: 11, kind: input, shape index: {}]   ;;  %s3979_s12 = inlined_call_operand.vmem [shape: f32[16,1], index: 12, kind: input, shape index: {}]   ;;  %s3980_s13 = inlined_call_operand.vmem [shape: f32[2,16,16], index: 13, kind: input, shape index: {}]   ;;  %s3981_s14 = inlined_call_operand.vmem [shape: f32[16,1], index: 14, kind: input, shape index: {}]   ;;  %s3982_s15 = inlined_call_operand.vmem [shape: f32[16,8], index: 15, kind: input, shape index: {}]   ;;  %s3983_s16 = inlined_call_operand.vmem [shape: f32[16,1], index: 16, kind: input, shape index: {}]   ;;  %s3984_s17 = inlined_call_operand.hbm [shape: f32[2,8,128], index: 17, kind: output, shape index: {0}]   ;;  %s3985_s18 = inlined_call_operand.hbm [shape: f32[2,8,128], index: 18, kind: output, shape index: {1}]   ;;  %s3986_s19 = inlined_call_operand.hbm [shape: f32[2,16,128], index: 19, kind: output, shape index: {2}]  }
   0x1   :  { %3998 = sst [smem:[#allocation14_spill]] %s3967_s0 }
   0x2   :  { %3999 = sst [smem:[#allocation15_spill]] %s3968_s1 }
   0x3   :  { %4000 = sst [smem:[#allocation16_spill]] %s3969_s2 }
   0x4   :  { %4001 = sst [smem:[#allocation17_spill]] %s3970_s3 }
   0x5   :  { %4002 = sst [smem:[#allocation18_spill]] %s3971_s4 }
   0x6   :  { %4003 = sst [smem:[#allocation19_spill]] %s3972_s5 }
   0x7   :  { %4004 = sst [smem:[#allocation20_spill]] %s3973_s6 }
   0x8   :  { %4005 = sst [smem:[#allocation21_spill]] %s3974_s7 }
   0x9   :  { %4006 = sst [smem:[#allocation22_spill]] %s3975_s8 }
   0xa   :  { %4007 = sst [smem:[#allocation23_spill]] %s3976_s9 }
   0xb   :  { %4008 = sst [smem:[#allocation24_spill]] %s3977_s10 }
   0xc   :  { %4009 = sst [smem:[#allocation25_spill]] %s3978_s11 }
   0xd   :  { %4010 = sst [smem:[#allocation26_spill]] %s3979_s12 }
   0xe   :  { %25 = vsyncpa [#allocation4], 0 }
   0xf   :  { %27 = vsyncpa [#allocation4 + $0x1], 0 }
  0x10   :  { %28 = vsyncpa [#allocation6], 0 }
  0x11   :  { %30 = vsyncpa [#allocation6 + $0x1], 0  ;;  %s3607_s0 = smov 0   ;;  %s3609_s30 = smov 0  }
  0x12   :  { %s3611_s20 = smov 0   ;;  %s3613_s21 = smov 0  }
  0x13 LB: > { %4011 = sst [smem:[#allocation10_spill]] %s3494_s20  ;;  %s3628_s1 = sadd.s32 4294967295, %s3498_s21   ;;  %s3498_s21 = sphi %s3613_s21, %s4035_s21   ;;  %s3494_s20 = sphi %s3611_s20, %s4037_s20   ;;  %s3490_s30 = sphi %s3609_s30, %s4039_s30   ;;  %s3486_s0 = sphi %s3607_s0, %s4038_s0  }
  0x14   : > { %s3989_s22 = sadd.s32 4294967294, %s3498_s21   ;;  %s3632_s2 = sadd.s32 1, %s3498_s21  }
  0x15   : > { %4012 = sst [smem:[#allocation11_spill]] %s3632_s2  ;;  %s405_s23 = sadd.s32 1, %s3494_s20 }
  0x16   : > { %s402_s24 = ssub.s32 %s3498_s21, %s3632_s2  ;;  %p415_p0 = scmp.ne.s32.totalorder %s3494_s20, %s3490_s30 }
  0x17   : > { %p403_p1 = scmp.eq.s32.totalorder %s402_s24, 0  ;;  %p416_p2 = scmp.eq.s32.totalorder %s3628_s1, 1 }
  0x18   : > { %p421_p3 = scmp.ne.s32.totalorder %s3490_s30, %s3486_s0  ;;  %p422_p4 = scmp.eq.s32.totalorder %s3989_s22, 1 }
  0x19   : > { %s3645_s25 = scalar_select %p403_p1, %s3494_s20, %s405_s23  }
  0x1a   : > { %p3647_p5 = por %p416_p2, %p415_p0  ;;  %p3651_p6 = por %p422_p4, %p421_p3 }
  0x1b   : > { %4013 = sst [smem:[#allocation12_spill]] %s3645_s25  ;;  %p3289_p7 = scmp.ge.s32.totalorder %s3498_s21, 1 }
  0x1c   : > { %s4015_s26 = scalar_select %p3651_p6, 1, 0 }
  0x1d   : > { %p547_p8 = scmp.lt.s32.totalorder %s3498_s21, 3 }
  0x1e   : > { %4016 = sst [smem:[#allocation13_spill]] %s4015_s26 }
  0x1f   : > { %p548_p9 = pnand %p3289_p7, %p547_p8 }
  0x20   : > { %p612_p10 = scmp.lt.s32.totalorder (!%p548_p9), %s3628_s1, 1  ;;  %s4017_s24 = sld [smem:[#allocation14_spill]] (!%p548_p9) }
  0x21   : > { %551 = sbr.rel (%p548_p9) target bundleno = 1806 (0x70e), region = 88  ;;  %s3501_s25 = smov (!%p548_p9), 1  }
  0x22   : > { %s4018_s26 = sld [smem:[#allocation16_spill]] (!%p548_p9)  ;;  %s3996_s20 = smov (!%p548_p9), 4  }
  0x23   : > { %s4020_s8 = sld [smem:[#allocation22_spill]] (!%p548_p9)  ;;  %s3305_s2 = sshll.u32 (!%p548_p9), %s3628_s1, 3 }
  0x24   : > { %s4021_s10 = sld [smem:[#allocation24_spill]] (!%p548_p9) }
  0x25   : > { %s4022_s12 = sld [smem:[#allocation26_spill]] (!%p548_p9) }
  0x26   : > { %v3500_v0 = vmov 0.0   ;;  %s613_s27 = scalar_select %p612_p10, %s3628_s1, 1  ;;  %v3502_v5 = vmov 0   ;;  %vm633_vm0 = vcmask 31744   ;;  %vm637_vm1 = vcmask 1043456  }
  0x27   : > { %616 = vst [vmem:[#allocation2 + $0x8] sm:$0xff] %v3500_v0  ;;  %3368 = vset.pattern.permute.xlu1 %v3502_v5  ;;  %3370 = vset.pattern.permute.xlu0 %v3502_v5  ;;  %vm631_vm2 = vcmask 7168   ;;  %s4023_s23 = sld [smem:[#allocation17_spill]]  ;;  %vm960_vm3 = vcmask 64512   ;;  %vm1438_vm4 = vcmask 15360   ;;  %vm2495_vm5 = vcmask 130048  }
  0x28   : > { %s3293_s28 = sshll.u32 %s613_s27, 2  ;;  %v938_v4 = vld [vmem:[%s4018_s26] sm:$0xff]  ;;  %3369 = vset.pattern.permute.xlu2 %v3502_v5  ;;  %s3995_s26 = smov 2  }
  0x29   : > { %s615_s22 = scalar_lea.vmem %s4017_s24, %s3293_s28  ;;  %941 = vperm.xlu1 %3368, %v938_v4   ;;  %v1739_v20 = vld [vmem:[%s4020_s8] sm:$0xff]  ;;  %s4024_s5 = sld [smem:[#allocation19_spill]] }
  0x2a   : > { %v618_v1 = vld [vmem:[%s615_s22] sm:$0xf]  ;;  %s4019_s22 = sld [smem:[#allocation15_spill]]  ;;  %s3737_s27 = sand.u32 1, %s3490_s30  }
  0x2b   : > { %621 = vst [vmem:[#allocation2 + $0x18] sm:$0xf] %v618_v1  ;;  %v790_v8 = vsel %vm637_vm1, %v618_v1, 0  ;;  %v2059_v33 = vld [vmem:[%s4021_s10] sm:$0xff]  ;;  %v2453_v37 = vld [vmem:[%s4022_s12 + $0x8] sm:$0xff]  ;;  %s4025_s4 = sld [smem:[#allocation18_spill]]  ;;  %s3128_s8 = scalar_lea.hbm %s3984_s17, %s3305_s2 }
  0x2c   : > { %v3675_v10 = vand.u32 4294901760, %v790_v8  ;;  %s4026_s6 = sld [smem:[#allocation20_spill]]  ;;  %s4030_s24 = sshll.u32 %s3737_s27, 3 }
  0x2d   : > { %v951_v1 = vld [vmem:[%s4023_s23] sm:$0xff]  ;;  %s4027_s7 = sld [smem:[#allocation21_spill]] }
  0x2e   : > { %v622_v2 = vld [vmem:[#allocation2 + $0x8] sm:$0xf]  ;;  %v3681_v13 = vsub.f32 %v790_v8, %v3675_v10  ;;  %s4029_s9 = sld [smem:[#allocation23_spill]] }
  0x2f   : > { %627 = vrot.lane.b32.xlu0 %v622_v2, %s3501_s25  ;;  %v962_v2 = vsel %vm960_vm3, %v951_v1, 0  ;;  %s4031_s11 = sld [smem:[#allocation25_spill]] }
  0x30   : > { %v624_v6 = vld [vmem:[%s4019_s22] sm:$0xff]  ;;  %v3294_v12 = vld [vmem:[%s4019_s22 + $0x8] sm:$0xff]  ;;  %v3687_v17 = vand.u32 4294901760, %v3681_v13 }
  0x31   : > { %v635_v7 = vsel %vm633_vm0, %v624_v6, 0  ;;  %954 = vrot.lane.b32.xlu1 %v3500_v0, %s3501_s25  ;;  %v787_v15 = vsel %vm633_vm0, %v3294_v12, 0  ;;  %v3295_v6 = vld [vmem:[%s4023_s23 + $0x8] sm:$0xff] }
  0x32   : > { %v623_v3 = vld [vmem:[#allocation2 + $0x18] sm:$0xf]  ;;  %v657_v9 = vand.u32 4294901760, %v635_v7  ;;  %v809_v18 = vand.u32 4294901760, %v787_v15  ;;  %v836_v21 = vsub.f32 %v3681_v13, %v3687_v17 }
  0x34   : > { %v658_v11 = vsub.f32 %v635_v7, %v657_v9  ;;  %v810_v23 = vsub.f32 %v787_v15, %v809_v18  ;;  %v3696_v28 = vand.u32 4294901760, %v836_v21 }
  0x36   : > { %v659_v16 = vand.u32 4294901760, %v658_v11  ;;  %v811_v29 = vand.u32 4294901760, %v810_v23 }
  0x37   : > { %629 = vrot.lane.b32.xlu0 %v623_v3, %s3501_s25  ;;  %v981_v3 = vand.u32 4294901760, %v962_v2 }
  0x38   : > { %v660_v19 = vsub.f32 %v658_v11, %v659_v16  ;;  %v812_v32 = vsub.f32 %v810_v23, %v811_v29 }
  0x39   : > { %1434 = vrot.lane.b32.xlu1 %v3500_v0, %s3995_s26  ;;  %v982_v5 = vsub.f32 %v962_v2, %v981_v3 }
  0x3a   : > { %v661_v26 = vand.u32 4294901760, %v660_v19  ;;  %v813_v36 = vand.u32 4294901760, %v812_v32 }
  0x3b   : > { %v983_v8 = vand.u32 4294901760, %v982_v5 }
  0x41   : > { %1742 = vperm.xlu1 %3368, %v1739_v20  }
  0x49   : > { %2062 = vperm.xlu1 %3368, %v2059_v33  }
  0x51   : > { %2461 = vperm.xlu1 %3368, %v2453_v37   ;;  %v1268_v37 = vld [vmem:[%s4026_s6] sm:$0xff]  ;;  %s3112_s6 = sand.u32 1, %s3628_s1  }
  0x9b   : > { %v942_v61 = vpop.permute.xlu1 %941 }
  0xa1   : > { %v628_v14 = vpop.permute.xlu0 %627 }
  0xa9   : > { %v630_v22 = vpop.permute.xlu0 %629 }
  0xaa   : > { %v632_v24 = vsel %vm631_vm2, %v628_v14, %v630_v22  ;;  %v984_v14 = vsub.f32 %v982_v5, %v983_v8 }
  0xab   : > { %v638_v25 = vsel %vm637_vm1, %v632_v24, 0  ;;  %v1267_v24 = vld [vmem:[%s4024_s5] sm:$0xff]  ;;  %s3142_s5 = scalar_lea.hbm %s3985_s18, %s3305_s2 }
  0xac   : > { %v655_v27 = vand.u32 4294901760, %v638_v25  ;;  %v985_v21 = vand.u32 4294901760, %v984_v14 }
  0xae   : > { %v682_v30 = vsub.f32 %v638_v25, %v655_v27  ;;  %656 = vmatpush.msra.mxu0 %v655_v27  ;;  %732 = vmatpush.msra.mxu3 %v655_v27 }
  0xaf   : > { %662 = vmatmul.f32.vlgmr.msra.gmra.mxu0 %v661_v26  ;;  %736 = vmatmul.f32.vlgmr.msra.gmra.mxu3 %v659_v16  ;;  %v955_v16 = vpop.permute.xlu1 %954 }
  0xb0   : > { %709 = vmatpush.msra.mxu2 %v682_v30  ;;  %v683_v31 = vand.u32 4294901760, %v682_v30  ;;  %838 = vmatpush.msrb.mxu3 %v3696_v28 }
  0xb1   : > { %712 = vmatmul.f32.vlgmr.msra.gmra.mxu2 %v658_v11 }
  0xb2   : > { %932 = vmatpush.msra.mxu3 %v3675_v10  ;;  %758 = vmatpush.msrb.mxu0 %v683_v31  ;;  %v684_v34 = vsub.f32 %v682_v30, %v683_v31 }
  0xb3   : > { %808 = vmatpush.msrb.mxu2 %v3675_v10 }
  0xb4   : > { %861 = vmatpush.msra.mxu0 %v3681_v13  ;;  %v685_v35 = vand.u32 4294901760, %v684_v34 }
  0xb5   : > { %910 = vmatpush.msra.mxu2 %v3687_v17 }
  0xb6   : > { %686 = vmatpush.msra.mxu1 %v685_v35 }
  0xb7   : > { %688 = vmatmul.f32.vlgmr.msra.gmra.mxu1 %v657_v9  ;;  %760 = vmatmul.f32.vlgmr.msrb.gmra.mxu0 %v657_v9 }
  0xb8   : > { %780 = vmatpush.msrb.mxu1 %v655_v27  ;;  %840 = vmatmul.f32.vlgmr.msrb.gmra.mxu3 %v809_v18 }
  0xb9   : > { %814 = vmatmul.f32.vlgmr.msrb.gmra.mxu2 %v813_v36  ;;  %v1259_v36 = vld [vmem:[%s4025_s4] sm:$0xff]  ;;  %s4028_s4 = smov 2  }
  0xba   : > { %884 = vmatpush.msra.mxu1 %v3675_v10  ;;  %1262 = vperm.xlu0 %3370, %v1259_v36  }
  0xbf   : > { %782 = vmatmul.f32.vlgmr.msrb.gmra.mxu1 %v657_v9  ;;  %864 = vmatmul.f32.vlgmr.msra.gmra.mxu0 %v810_v23  ;;  %v1111_v9 = vsel %vm960_vm3, %v3295_v6, 0 }
  0xc0   : > { %934 = vmatmul.f32.vlgmr.msra.gmra.mxu3 %v809_v18  ;;  %v1130_v12 = vand.u32 4294901760, %v1111_v9 }
  0xc1   : > { %912 = vmatmul.f32.vlgmr.msra.gmra.mxu2 %v809_v18 }
  0xc2   : > { %v1131_v19 = vsub.f32 %v1111_v9, %v1130_v12 }
  0xc4   : > { %v1132_v26 = vand.u32 4294901760, %v1131_v19 }
  0xc6   : > { %v1133_v31 = vsub.f32 %v1131_v19, %v1132_v26 }
  0xc7   : > { %888 = vmatmul.f32.vlgmr.msra.gmra.mxu1 %v811_v29  ;;  %v1275_v29 = vsel %vm633_vm0, %v1267_v24, 0  ;;  %v3296_v24 = vld [vmem:[%s4027_s7 + $0x8] sm:$0xff] }
  0xc8   : > { %v1294_v32 = vand.u32 4294901760, %v1275_v29  ;;  %v1134_v34 = vand.u32 4294901760, %v1133_v31 }
  0xca   : > { %v1295_v35 = vsub.f32 %v1275_v29, %v1294_v32 }
 0x12c   : > { %v663_v38 = vpop.f32.mrf.mxu0 }
 0x132   : > { %v737_v39 = vpop.f32.mrf.mxu3 }
 0x134   : > { %v689_v40 = vpop.f32.mrf.mxu1  ;;  %v713_v41 = vpop.f32.mrf.mxu2 }
 0x135   : > { %v690_v42 = vadd.f32 %v689_v40, %v663_v38  ;;  %v761_v43 = vpop.f32.mrf.mxu0  ;;  %v1296_v38 = vand.u32 4294901760, %v1295_v35 }
 0x137   : > { %v714_v44 = vadd.f32 %v713_v41, %v690_v42 }
 0x139   : > { %v738_v45 = vadd.f32 %v737_v39, %v714_v44  ;;  %v1297_v39 = vsub.f32 %v1295_v35, %v1296_v38 }
 0x13b   : > { %v762_v46 = vadd.f32 %v761_v43, %v738_v45  ;;  %v841_v47 = vpop.f32.mrf.mxu3  ;;  %v1298_v40 = vand.u32 4294901760, %v1297_v39 }
 0x13c   : > { %v783_v48 = vpop.f32.mrf.mxu1  ;;  %v815_v49 = vpop.f32.mrf.mxu2 }
 0x13d   : > { %v784_v50 = vadd.f32 %v783_v48, %v762_v46  ;;  %v865_v52 = vpop.f32.mrf.mxu0 }
 0x13f   : > { %v816_v51 = vadd.f32 %v815_v49, %v784_v50 }
 0x141   : > { %v842_v53 = vadd.f32 %v841_v47, %v816_v51 }
 0x143   : > { %v866_v54 = vadd.f32 %v865_v52, %v842_v53  ;;  %v935_v58 = vpop.f32.mrf.mxu3 }
 0x144   : > { %v889_v55 = vpop.f32.mrf.mxu1  ;;  %v913_v56 = vpop.f32.mrf.mxu2 }
 0x145   : > { %v890_v57 = vadd.f32 %v889_v55, %v866_v54 }
 0x147   : > { %v914_v59 = vadd.f32 %v913_v56, %v890_v57 }
 0x149   : > { %v936_v60 = vadd.f32 %v935_v58, %v914_v59 }
 0x14b   : > { %v944_v62 = vadd.f32 %v942_v61, %v936_v60 }
 0x14d   : > { %v945_v63 = vmax.f32 %v944_v62, 0.0 }
 0x14f   : > { %956 = vrot.lane.b32.xlu2 %v945_v63, %s3501_s25  ;;  %v1128_v4 = vand.u32 4294901760, %v945_v63  ;;  %s3994_s25 = sshll.u32 %s3737_s27, 3 }
 0x150   : > { %s3746_s28 = scalar_lea.vmem [#allocation3], %s3994_s25  ;;  %s4032_s25 = smov 4  }
 0x151   : > { %v1155_v7 = vsub.f32 %v945_v63, %v1128_v4 }
 0x153   : > { %v1156_v11 = vand.u32 4294901760, %v1155_v7 }
 0x155   : > { %v1157_v15 = vsub.f32 %v1155_v7, %v1156_v11 }
 0x157   : > { %v1158_v23 = vand.u32 4294901760, %v1157_v15  ;;  %1271 = vperm.xlu2 %3369, %v1268_v37  }
 0x1a9   : > { %v957_v18 = vpop.permute.xlu2 %956 }
 0x1aa   : > { %v958_v20 = vsel %vm631_vm2, %v955_v16, %v957_v18  ;;  %v2452_v18 = vld [vmem:[%s4022_s12] sm:$0xff] }
 0x1ab   : > { %v979_v22 = vand.u32 4294901760, %v958_v20 }
 0x1ad   : > { %v1006_v25 = vsub.f32 %v958_v20, %v979_v22  ;;  %980 = vmatpush.msrb.mxu0 %v979_v22  ;;  %1056 = vmatpush.msrb.mxu3 %v979_v22 }
 0x1ae   : > { %986 = vmatmul.f32.vlgmr.msrb.gmra.mxu0 %v985_v21  ;;  %1060 = vmatmul.f32.vlgmr.msrb.gmra.mxu3 %v983_v8 }
 0x1af   : > { %1159 = vmatpush.msra.mxu3 %v1158_v23  ;;  %v1007_v27 = vand.u32 4294901760, %v1006_v25  ;;  %1033 = vmatpush.msrb.mxu2 %v1006_v25 }
 0x1b0   : > { %1036 = vmatmul.f32.vlgmr.msrb.gmra.mxu2 %v982_v5 }
 0x1b1   : > { %1253 = vmatpush.msrb.mxu3 %v1128_v4  ;;  %1129 = vmatpush.msra.mxu2 %v1128_v4  ;;  %v1008_v30 = vsub.f32 %v1006_v25, %v1007_v27  ;;  %v1272_v59 = vpop.permute.xlu2 %1271 }
 0x1b2   : > { %1082 = vmatpush.msra.mxu0 %v1007_v27  ;;  %v1591_v27 = vsel %vm960_vm3, %v3296_v24, 0 }
 0x1b3   : > { %1231 = vmatpush.msrb.mxu2 %v1156_v11  ;;  %v1009_v33 = vand.u32 4294901760, %v1008_v30  ;;  %v1610_v30 = vand.u32 4294901760, %v1591_v27 }
 0x1b4   : > { %1182 = vmatpush.msrb.mxu0 %v1155_v7 }
 0x1b5   : > { %1010 = vmatpush.msrb.mxu1 %v1009_v33  ;;  %v1435_v33 = vpop.permute.xlu1 %1434 }
 0x1b6   : > { %1012 = vmatmul.f32.vlgmr.msrb.gmra.mxu1 %v981_v3  ;;  %1084 = vmatmul.f32.vlgmr.msra.gmra.mxu0 %v981_v3 }
 0x1b7   : > { %1104 = vmatpush.msra.mxu1 %v979_v22  ;;  %1161 = vmatmul.f32.vlgmr.msra.gmra.mxu3 %v1130_v12 }
 0x1b8   : > { %1293 = vmatpush.msra.mxu0 %v3675_v10  ;;  %1135 = vmatmul.f32.vlgmr.msra.gmra.mxu2 %v1134_v34 }
 0x1b9   : > { %1205 = vmatpush.msrb.mxu1 %v1128_v4  ;;  %1369 = vmatpush.msra.mxu3 %v3675_v10 }
 0x1ba   : > { %1346 = vmatpush.msra.mxu2 %v3681_v13 }
 0x1be   : > { %1106 = vmatmul.f32.vlgmr.msra.gmra.mxu1 %v981_v3  ;;  %1185 = vmatmul.f32.vlgmr.msrb.gmra.mxu0 %v1131_v19  ;;  %v1263_v3 = vpop.permute.xlu0 %1262  ;;  %v1431_v19 = vld [vmem:[%s4027_s7] sm:$0xff] }
 0x1bf   : > { %1255 = vmatmul.f32.vlgmr.msrb.gmra.mxu3 %v1130_v12  ;;  %1323 = vmatpush.msra.mxu1 %v3696_v28  ;;  %v1442_v20 = vsel %vm960_vm3, %v1431_v19, 0 }
 0x1c0   : > { %1395 = vmatpush.msrb.mxu0 %v3687_v17  ;;  %1233 = vmatmul.f32.vlgmr.msrb.gmra.mxu2 %v1130_v12  ;;  %v1461_v21 = vand.u32 4294901760, %v1442_v20 }
 0x1c2   : > { %v1462_v23 = vsub.f32 %v1442_v20, %v1461_v21 }
 0x1c6   : > { %1209 = vmatmul.f32.vlgmr.msrb.gmra.mxu1 %v1132_v26  ;;  %1299 = vmatmul.f32.vlgmr.msra.gmra.mxu0 %v1298_v40  ;;  %v1463_v26 = vand.u32 4294901760, %v1462_v23 }
 0x1c7   : > { %1373 = vmatmul.f32.vlgmr.msra.gmra.mxu3 %v1296_v38  ;;  %1417 = vmatpush.msrb.mxu1 %v3675_v10 }
 0x1c8   : > { %1349 = vmatmul.f32.vlgmr.msra.gmra.mxu2 %v1295_v35  ;;  %v1464_v31 = vsub.f32 %v1462_v23, %v1463_v26  ;;  %v1611_v35 = vsub.f32 %v1591_v27, %v1610_v30 }
 0x1ca   : > { %v1465_v37 = vand.u32 4294901760, %v1464_v31 }
 0x1ce   : > { %1325 = vmatmul.f32.vlgmr.msra.gmra.mxu1 %v1294_v32  ;;  %1397 = vmatmul.f32.vlgmr.msrb.gmra.mxu0 %v1294_v32 }
 0x1d6   : > { %1419 = vmatmul.f32.vlgmr.msrb.gmra.mxu1 %v1294_v32 }
 0x22b   : > { %v987_v13 = vpop.f32.mrf.mxu0 }
 0x231   : > { %v1061_v41 = vpop.f32.mrf.mxu3 }
 0x233   : > { %v1013_v42 = vpop.f32.mrf.mxu1  ;;  %v1085_v43 = vpop.f32.mrf.mxu0 }
 0x234   : > { %v1014_v44 = vadd.f32 %v1013_v42, %v987_v13  ;;  %v1037_v45 = vpop.f32.mrf.mxu2  ;;  %v1612_v13 = vand.u32 4294901760, %v1611_v35 }
 0x236   : > { %v1038_v28 = vadd.f32 %v1037_v45, %v1014_v44 }
 0x238   : > { %v1062_v46 = vadd.f32 %v1061_v41, %v1038_v28 }
 0x23a   : > { %v1086_v17 = vadd.f32 %v1085_v43, %v1062_v46  ;;  %v1162_v47 = vpop.f32.mrf.mxu3  ;;  %v1613_v43 = vsub.f32 %v1611_v35, %v1612_v13 }
 0x23b   : > { %v1107_v48 = vpop.f32.mrf.mxu1  ;;  %v1186_v49 = vpop.f32.mrf.mxu0 }
 0x23c   : > { %v1108_v50 = vadd.f32 %v1107_v48, %v1086_v17  ;;  %v1136_v51 = vpop.f32.mrf.mxu2  ;;  %v1614_v45 = vand.u32 4294901760, %v1613_v43 }
 0x23e   : > { %v1137_v52 = vadd.f32 %v1136_v51, %v1108_v50 }
 0x240   : > { %v1163_v10 = vadd.f32 %v1162_v47, %v1137_v52 }
 0x242   : > { %v1187_v53 = vadd.f32 %v1186_v49, %v1163_v10  ;;  %v1256_v55 = vpop.f32.mrf.mxu3 }
 0x243   : > { %v1210_v54 = vpop.f32.mrf.mxu1  ;;  %v1300_v58 = vpop.f32.mrf.mxu0 }
 0x244   : > { %v1211_v56 = vadd.f32 %v1210_v54, %v1187_v53  ;;  %v1234_v57 = vpop.f32.mrf.mxu2  ;;  %v1301_v61 = vadd.f32 %v1300_v58, %v1272_v59 }
 0x246   : > { %v1235_v60 = vadd.f32 %v1234_v57, %v1211_v56 }
 0x248   : > { %v1257_v63 = vadd.f32 %v1256_v55, %v1235_v60 }
 0x24a   : > { %v1374_v4 = vpop.f32.mrf.mxu3  ;;  %v1265_v7 = vadd.f32 %v1263_v3, %v1257_v63  ;;  %v1743_v3 = vpop.permute.xlu1 %1742 }
 0x24b   : > { %v1326_v62 = vpop.f32.mrf.mxu1  ;;  %v1398_v6 = vpop.f32.mrf.mxu0 }
 0x24c   : > { %v1327_v1 = vadd.f32 %v1326_v62, %v1301_v61  ;;  %v1350_v2 = vpop.f32.mrf.mxu2  ;;  %v1266_v12 = vmax.f32 %v1265_v7, 0.0 }
 0x24e   : > { %v1351_v5 = vadd.f32 %v1350_v2, %v1327_v1 }
 0x250   : > { %v1375_v8 = vadd.f32 %v1374_v4, %v1351_v5 }
 0x252   : > { %v1399_v9 = vadd.f32 %v1398_v6, %v1375_v8  ;;  %v1752_v6 = vld [vmem:[%s4029_s9] sm:$0xff] }
 0x253   : > { %v1420_v11 = vpop.f32.mrf.mxu1  ;;  %v1762_v7 = vsel %vm960_vm3, %v1752_v6, 0 }
 0x254   : > { %v1421_v14 = vadd.f32 %v1420_v11, %v1399_v9  ;;  %v1781_v8 = vand.u32 4294901760, %v1762_v7 }
 0x256   : > { %v1423_v15 = vadd.f32 %v1421_v14, %v1266_v12  ;;  %v1782_v11 = vsub.f32 %v1762_v7, %v1781_v8  ;;  %v3297_v12 = vld [vmem:[%s4029_s9 + $0x8] sm:$0xff]  ;;  %s3907_s9 = scalar_lea.sflag [#allocation6], %s3112_s6 }
 0x258   : > { %v3740_v16 = vmax.f32 %v1423_v15, 0.0  ;;  %v1783_v15 = vand.u32 4294901760, %v1782_v11 }
 0x25a   : > { %1436 = vrot.lane.b32.xlu2 %v3740_v16, %s3995_s26  ;;  %1425 = vst [vmem:[%s3746_s28] sm:$0xff] %v3740_v16  ;;  %v1608_v22 = vand.u32 4294901760, %v3740_v16 }
 0x25c   : > { %v1635_v25 = vsub.f32 %v3740_v16, %v1608_v22 }
 0x25e   : > { %v1636_v29 = vand.u32 4294901760, %v1635_v25 }
 0x260   : > { %v1637_v32 = vsub.f32 %v1635_v25, %v1636_v29 }
 0x262   : > { %1755 = vrot.lane.b32.xlu2 %v3500_v0, %s3995_s26  ;;  %v1638_v39 = vand.u32 4294901760, %v1637_v32  ;;  %s3146_s26 = sshll.u32 %s3142_s5, 4  ;;  %s3147_s26 = int_to_ptr.hbm [resolvable:$true] %s3146_s26 }
 0x263   : > { %s3390_s10 = sshra.s32 %s3147_s26, 4  ;;  %s3391_s10 = int_to_ptr.hbm [resolvable:$true] %s3390_s10 }
 0x264   : > { %p3397_p0 = scmp.lt.s32.totalorder %s3391_s10, %s3985_s18 }
 0x26a   : > { %2080 = vrot.lane.b32.xlu2 %v3500_v0, %s3996_s20 }
 0x272   : > { %2456 = vperm.xlu2 %3369, %v2452_v18   ;;  %v1911_v18 = vsel %vm960_vm3, %v3297_v12, 0 }
 0x273   : > { %v1930_v20 = vand.u32 4294901760, %v1911_v18 }
 0x2b4   : > { %v1437_v34 = vpop.permute.xlu2 %1436 }
 0x2b5   : > { %v1439_v36 = vsel %vm1438_vm4, %v1435_v33, %v1437_v34 }
 0x2b6   : > { %v1459_v38 = vand.u32 4294901760, %v1439_v36 }
 0x2b8   : > { %v1486_v40 = vsub.f32 %v1439_v36, %v1459_v38  ;;  %1460 = vmatpush.msrb.mxu2 %v1459_v38  ;;  %1536 = vmatpush.msra.mxu1 %v1459_v38 }
 0x2b9   : > { %1466 = vmatmul.f32.vlgmr.msrb.gmra.mxu2 %v1465_v37  ;;  %1540 = vmatmul.f32.vlgmr.msra.gmra.mxu1 %v1463_v26 }
 0x2ba   : > { %1639 = vmatpush.msrb.mxu1 %v1638_v39  ;;  %v1487_v41 = vand.u32 4294901760, %v1486_v40  ;;  %1513 = vmatpush.msra.mxu0 %v1486_v40 }
 0x2bb   : > { %1516 = vmatmul.f32.vlgmr.msra.gmra.mxu0 %v1462_v23 }
 0x2bc   : > { %1733 = vmatpush.msra.mxu1 %v1608_v22  ;;  %1609 = vmatpush.msrb.mxu0 %v1608_v22  ;;  %v1488_v42 = vsub.f32 %v1486_v40, %v1487_v41  ;;  %v1756_v23 = vpop.permute.xlu2 %1755 }
 0x2bd   : > { %1562 = vmatpush.msra.mxu2 %v1487_v41 }
 0x2be   : > { %1711 = vmatpush.msra.mxu0 %v1636_v29  ;;  %v1489_v44 = vand.u32 4294901760, %v1488_v42 }
 0x2bf   : > { %1662 = vmatpush.msrb.mxu2 %v1635_v25  ;;  %v1931_v25 = vsub.f32 %v1911_v18, %v1930_v20 }
 0x2c0   : > { %1490 = vmatpush.msrb.mxu3 %v1489_v44 }
 0x2c1   : > { %1492 = vmatmul.f32.vlgmr.msrb.gmra.mxu3 %v1461_v21  ;;  %1564 = vmatmul.f32.vlgmr.msra.gmra.mxu2 %v1461_v21  ;;  %v1932_v32 = vand.u32 4294901760, %v1931_v25 }
 0x2c2   : > { %1584 = vmatpush.msra.mxu3 %v1459_v38  ;;  %1641 = vmatmul.f32.vlgmr.msrb.gmra.mxu1 %v1610_v30 }
 0x2c3   : > { %1615 = vmatmul.f32.vlgmr.msrb.gmra.mxu0 %v1614_v45 }
 0x2c4   : > { %1685 = vmatpush.msrb.mxu3 %v1608_v22  ;;  %v2081_v18 = vpop.permute.xlu2 %2080 }
 0x2c9   : > { %1586 = vmatmul.f32.vlgmr.msra.gmra.mxu3 %v1461_v21  ;;  %1665 = vmatmul.f32.vlgmr.msrb.gmra.mxu2 %v1611_v35  ;;  %v1784_v21 = vsub.f32 %v1782_v11, %v1783_v15  ;;  %v1933_v35 = vsub.f32 %v1931_v25, %v1932_v32 }
 0x2ca   : > { %1735 = vmatmul.f32.vlgmr.msra.gmra.mxu1 %v1610_v30 }
 0x2cb   : > { %1713 = vmatmul.f32.vlgmr.msra.gmra.mxu0 %v1610_v30  ;;  %v1785_v27 = vand.u32 4294901760, %v1784_v21  ;;  %v1934_v37 = vand.u32 4294901760, %v1933_v35 }
 0x2d1   : > { %1689 = vmatmul.f32.vlgmr.msrb.gmra.mxu3 %v1612_v13 }
 0x336   : > { %v1541_v17 = vpop.f32.mrf.mxu1 }
 0x338   : > { %v1517_v46 = vpop.f32.mrf.mxu0 }
 0x33c   : > { %v1467_v28 = vpop.f32.mrf.mxu2 }
 0x33f   : > { %v1642_v54 = vpop.f32.mrf.mxu1 }
 0x340   : > { %v1616_v52 = vpop.f32.mrf.mxu0 }
 0x344   : > { %v1493_v47 = vpop.f32.mrf.mxu3  ;;  %v1565_v49 = vpop.f32.mrf.mxu2 }
 0x345   : > { %v1494_v48 = vadd.f32 %v1493_v47, %v1467_v28 }
 0x347   : > { %v1518_v50 = vadd.f32 %v1517_v46, %v1494_v48  ;;  %v1736_v63 = vpop.f32.mrf.mxu1 }
 0x348   : > { %v1714_v61 = vpop.f32.mrf.mxu0 }
 0x349   : > { %v1542_v51 = vadd.f32 %v1541_v17, %v1518_v50 }
 0x34b   : > { %v1566_v10 = vadd.f32 %v1565_v49, %v1542_v51 }
 0x34c   : > { %v1587_v53 = vpop.f32.mrf.mxu3  ;;  %v1666_v57 = vpop.f32.mrf.mxu2 }
 0x34d   : > { %v1588_v55 = vadd.f32 %v1587_v53, %v1566_v10 }
 0x34f   : > { %v1617_v56 = vadd.f32 %v1616_v52, %v1588_v55 }
 0x351   : > { %v1643_v58 = vadd.f32 %v1642_v54, %v1617_v56 }
 0x353   : > { %v1667_v59 = vadd.f32 %v1666_v57, %v1643_v58  ;;  %v2063_v57 = vpop.permute.xlu1 %2062 }
 0x354   : > { %v1690_v60 = vpop.f32.mrf.mxu3 }
 0x355   : > { %v1691_v62 = vadd.f32 %v1690_v60, %v1667_v59 }
 0x357   : > { %v1715_v1 = vadd.f32 %v1714_v61, %v1691_v62  ;;  %v2906_v62 = vld [vmem:[%s3983_s16] sm:$0xff] }
 0x359   : > { %v1737_v2 = vadd.f32 %v1736_v63, %v1715_v1  ;;  %v2076_v63 = vld [vmem:[%s4031_s11] sm:$0xff] }
 0x35a   : > { %v2087_v1 = vsel %vm960_vm3, %v2076_v63, 0 }
 0x35b   : > { %v1745_v4 = vadd.f32 %v1743_v3, %v1737_v2  ;;  %v2109_v2 = vand.u32 4294901760, %v2087_v1 }
 0x35d   : > { %v1746_v5 = vmax.f32 %v1745_v4, 0.0  ;;  %v2110_v4 = vsub.f32 %v2087_v1, %v2109_v2 }
 0x35f   : > { %1757 = vrot.lane.b32.xlu0 %v1746_v5, %s4028_s4  ;;  %v1928_v9 = vand.u32 4294901760, %v1746_v5  ;;  %s3782_s4 = scalar_lea.vmem [#allocation5], %s4030_s24  ;;  %v2111_v7 = vand.u32 4294901760, %v2110_v4 }
 0x361   : > { %v1955_v14 = vsub.f32 %v1746_v5, %v1928_v9 }
 0x363   : > { %v1956_v19 = vand.u32 4294901760, %v1955_v14 }
 0x365   : > { %v1957_v22 = vsub.f32 %v1955_v14, %v1956_v19 }
 0x367   : > { %v1958_v30 = vand.u32 4294901760, %v1957_v22 }
 0x3d1   : > { %v1758_v24 = vpop.permute.xlu0 %1757 }
 0x3d2   : > { %v1759_v26 = vsel %vm1438_vm4, %v1756_v23, %v1758_v24 }
 0x3d3   : > { %v1779_v29 = vand.u32 4294901760, %v1759_v26 }
 0x3d5   : > { %v1806_v31 = vsub.f32 %v1759_v26, %v1779_v29  ;;  %1780 = vmatpush.msra.mxu2 %v1779_v29  ;;  %1856 = vmatpush.msrb.mxu1 %v1779_v29 }
 0x3d6   : > { %1786 = vmatmul.f32.vlgmr.msra.gmra.mxu2 %v1785_v27  ;;  %1860 = vmatmul.f32.vlgmr.msrb.gmra.mxu1 %v1783_v15 }
 0x3d7   : > { %1959 = vmatpush.msra.mxu1 %v1958_v30  ;;  %v1807_v33 = vand.u32 4294901760, %v1806_v31  ;;  %1833 = vmatpush.msrb.mxu0 %v1806_v31 }
 0x3d8   : > { %1836 = vmatmul.f32.vlgmr.msrb.gmra.mxu0 %v1782_v11  ;;  %v2112_v11 = vsub.f32 %v2110_v4, %v2111_v7 }
 0x3d9   : > { %2053 = vmatpush.msrb.mxu1 %v1928_v9  ;;  %1929 = vmatpush.msra.mxu0 %v1928_v9  ;;  %v1808_v34 = vsub.f32 %v1806_v31, %v1807_v33  ;;  %v3299_v31 = vld [vmem:[%s4031_s11 + $0x18] sm:$0xff] }
 0x3da   : > { %1882 = vmatpush.msrb.mxu2 %v1807_v33  ;;  %v2113_v21 = vand.u32 4294901760, %v2112_v11  ;;  %v2273_v35 = vsel %vm960_vm3, %v3299_v31, 0 }
 0x3db   : > { %2031 = vmatpush.msrb.mxu0 %v1956_v19  ;;  %v1809_v36 = vand.u32 4294901760, %v1808_v34 }
 0x3dc   : > { %1982 = vmatpush.msra.mxu2 %v1955_v14  ;;  %v3298_v14 = vld [vmem:[%s4031_s11 + $0x10] sm:$0xff] }
 0x3dd   : > { %1810 = vmatpush.msra.mxu3 %v1809_v36  ;;  %v2270_v23 = vsel %vm960_vm3, %v3298_v14, 0 }
 0x3de   : > { %1812 = vmatmul.f32.vlgmr.msra.gmra.mxu3 %v1781_v8  ;;  %1884 = vmatmul.f32.vlgmr.msrb.gmra.mxu2 %v1781_v8  ;;  %v2292_v27 = vand.u32 4294901760, %v2270_v23 }
 0x3df   : > { %1904 = vmatpush.msrb.mxu3 %v1779_v29  ;;  %1961 = vmatmul.f32.vlgmr.msra.gmra.mxu1 %v1930_v20 }
 0x3e0   : > { %1935 = vmatmul.f32.vlgmr.msra.gmra.mxu0 %v1934_v37  ;;  %v2293_v33 = vsub.f32 %v2270_v23, %v2292_v27 }
 0x3e1   : > { %2005 = vmatpush.msra.mxu3 %v1928_v9 }
 0x3e2   : > { %v2294_v37 = vand.u32 4294901760, %v2293_v33 }
 0x3e6   : > { %1906 = vmatmul.f32.vlgmr.msrb.gmra.mxu3 %v1781_v8  ;;  %1985 = vmatmul.f32.vlgmr.msra.gmra.mxu2 %v1931_v25 }
 0x3e7   : > { %2055 = vmatmul.f32.vlgmr.msrb.gmra.mxu1 %v1930_v20 }
 0x3e8   : > { %2033 = vmatmul.f32.vlgmr.msrb.gmra.mxu0 %v1930_v20 }
 0x3ee   : > { %2009 = vmatmul.f32.vlgmr.msra.gmra.mxu3 %v1932_v32 }
 0x453   : > { %v1861_v40 = vpop.f32.mrf.mxu1 }
 0x455   : > { %v1837_v39 = vpop.f32.mrf.mxu0 }
 0x459   : > { %v1787_v38 = vpop.f32.mrf.mxu2 }
 0x45c   : > { %v1962_v17 = vpop.f32.mrf.mxu1 }
 0x45d   : > { %v1936_v45 = vpop.f32.mrf.mxu0 }
 0x461   : > { %v1813_v13 = vpop.f32.mrf.mxu3  ;;  %v1885_v42 = vpop.f32.mrf.mxu2 }
 0x462   : > { %v1814_v41 = vadd.f32 %v1813_v13, %v1787_v38  ;;  %v2300_v38 = vand.u32 4294901760, %v2273_v35 }
 0x464   : > { %v1838_v43 = vadd.f32 %v1837_v39, %v1814_v41  ;;  %v2056_v54 = vpop.f32.mrf.mxu1  ;;  %v2295_v39 = vsub.f32 %v2293_v33, %v2294_v37 }
 0x465   : > { %v2034_v10 = vpop.f32.mrf.mxu0 }
 0x466   : > { %v1862_v44 = vadd.f32 %v1861_v40, %v1838_v43  ;;  %v2301_v40 = vsub.f32 %v2273_v35, %v2300_v38  ;;  %v2296_v13 = vand.u32 4294901760, %v2295_v39  ;;  %v2477_v39 = vld [vmem:[%s3980_s13] sm:$0xff] }
 0x468   : > { %v1886_v28 = vadd.f32 %v1885_v42, %v1862_v44  ;;  %v2302_v41 = vand.u32 4294901760, %v2301_v40 }
 0x469   : > { %v1907_v46 = vpop.f32.mrf.mxu3  ;;  %v1986_v49 = vpop.f32.mrf.mxu2 }
 0x46a   : > { %v1908_v47 = vadd.f32 %v1907_v46, %v1886_v28  ;;  %v2303_v42 = vsub.f32 %v2301_v40, %v2302_v41 }
 0x46c   : > { %v1937_v48 = vadd.f32 %v1936_v45, %v1908_v47  ;;  %v2304_v43 = vand.u32 4294901760, %v2303_v42 }
 0x46e   : > { %v1963_v50 = vadd.f32 %v1962_v17, %v1937_v48 }
 0x470   : > { %v1987_v51 = vadd.f32 %v1986_v49, %v1963_v50 }
 0x471   : > { %v2010_v52 = vpop.f32.mrf.mxu3 }
 0x472   : > { %v2011_v53 = vadd.f32 %v2010_v52, %v1987_v51 }
 0x474   : > { %v2035_v55 = vadd.f32 %v2034_v10, %v2011_v53 }
 0x476   : > { %v2057_v56 = vadd.f32 %v2056_v54, %v2035_v55 }
 0x478   : > { %v2065_v58 = vadd.f32 %v2063_v57, %v2057_v56 }
 0x47a   : > { %v2066_v59 = vmax.f32 %v2065_v58, 0.0 }
 0x47c   : > { %v2067_v60 = vadd.f32 %v2066_v59, %v3740_v16  ;;  %v2889_v16 = vld [vmem:[%s3981_s14 + $0x8] sm:$0xff] }
 0x47e   : > { %v2068_v61 = vmax.f32 %v2067_v60, 0.0 }
 0x480   : > { %2082 = vrot.lane.b32.xlu0 %v2068_v61, %s3996_s20  ;;  %2069 = vst [vmem:[%s3782_s4] sm:$0xff] %v2068_v61  ;;  %v3797_v3 = vand.u32 4294901760, %v2068_v61 }
 0x482   : > { %v3804_v6 = vsub.f32 %v2068_v61, %v3797_v3 }
 0x484   : > { %v3807_v9 = vand.u32 4294901760, %v3804_v6 }
 0x486   : > { %v2327_v15 = vsub.f32 %v3804_v6, %v3807_v9 }
 0x488   : > { %3372 = vrot.lane.b32.xlu0 %v3500_v0, %s3996_s20  ;;  %v2077_v0 = vld [vmem:[%s4031_s11 + $0x8] sm:$0xff]  ;;  %v3816_v25 = vand.u32 4294901760, %v2327_v15  ;;  %s3144_s20 = sshll.u32 %s3782_s4, 4  ;;  %s3392_s11 = scalar_lea.hbm %s3391_s10, 8  ;;  %s3145_s20 = int_to_ptr.vmem [resolvable:$true] %s3144_s20 }
 0x489   : > { %v2090_v5 = vsel %vm960_vm3, %v2077_v0, 0  ;;  %p3393_p11 = scmp.ne.s32.totalorder %s3391_s10, %s3392_s11  ;;  %s3396_s4 = scalar_lea.hbm %s3985_s18, 16 }
 0x48a   : > { %v2117_v8 = vand.u32 4294901760, %v2090_v5  ;;  %p3398_p1 = scmp.lt.s32.totalorder %s3396_s4, %s3392_s11 }
 0x48b   : > { %p3394_p12 = pnand %p3393_p11, %p3647_p5 }
 0x48c   : > { %v2118_v12 = vsub.f32 %v2090_v5, %v2117_v8  ;;  %p3399_p2 = por %p3398_p1, %p3397_p0 }
 0x48d   : > { %p3395_p13 = pneg %p3394_p12 }
 0x48e   : > { %v2119_v22 = vand.u32 4294901760, %v2118_v12 }
 0x48f   : > { %p3400_p3 = pnand %p3399_p2, %p3395_p13 }
 0x490   : > { %2910 = vperm.xlu0 %3370, %v2906_v62   ;;  %v2120_v29 = vsub.f32 %v2118_v12, %v2119_v22 }
 0x492   : > { %v2121_v34 = vand.u32 4294901760, %v2120_v29 }
 0x498   : > { %2897 = vperm.xlu0 %3370, %v2889_v16  }
 0x4f2   : > { %v2083_v19 = vpop.permute.xlu0 %2082 }
 0x4f3   : > { %v2084_v20 = vsel %vm633_vm0, %v2081_v18, %v2083_v19 }
 0x4f4   : > { %v2107_v24 = vand.u32 4294901760, %v2084_v20 }
 0x4f6   : > { %v2142_v26 = vsub.f32 %v2084_v20, %v2107_v24  ;;  %2108 = vmatpush.msrb.mxu2 %v2107_v24  ;;  %2201 = vmatpush.msra.mxu1 %v2107_v24 }
 0x4f7   : > { %2114 = vmatmul.f32.vlgmr.msrb.gmra.mxu2 %v2113_v21  ;;  %2205 = vmatmul.f32.vlgmr.msra.gmra.mxu1 %v2111_v7 }
 0x4f8   : > { %2329 = vmatpush.msrb.mxu1 %v3816_v25  ;;  %v2143_v30 = vand.u32 4294901760, %v2142_v26  ;;  %2173 = vmatpush.msra.mxu0 %v2142_v26 }
 0x4f9   : > { %2176 = vmatmul.f32.vlgmr.msra.gmra.mxu0 %v2110_v4 }
 0x4fa   : > { %2442 = vmatpush.msra.mxu1 %v3797_v3  ;;  %2291 = vmatpush.msrb.mxu0 %v3797_v3  ;;  %v2144_v32 = vsub.f32 %v2142_v26, %v2143_v30 }
 0x4fb   : > { %2233 = vmatpush.msra.mxu2 %v2143_v30 }
 0x4fc   : > { %2416 = vmatpush.msra.mxu0 %v3807_v9  ;;  %v2145_v36 = vand.u32 4294901760, %v2144_v32 }
 0x4fd   : > { %2356 = vmatpush.msrb.mxu2 %v3804_v6 }
 0x4fe   : > { %2146 = vmatpush.msrb.mxu3 %v2145_v36  ;;  %v2888_v36 = vld [vmem:[%s3981_s14] sm:$0xff] }
 0x4ff   : > { %2122 = vmatmul.f32.gmra.mxu2 %v2121_v34  ;;  %2148 = vmatmul.f32.vlgmr.msrb.gmra.mxu3 %v2109_v2  ;;  %v2462_v34 = vpop.permute.xlu1 %2461 }
 0x500   : > { %2259 = vmatpush.msra.mxu3 %v2107_v24  ;;  %2211 = vmatmul.f32.gmra.mxu1 %v2119_v22  ;;  %v2457_v22 = vpop.permute.xlu2 %2456 }
 0x501   : > { %2181 = vmatmul.f32.gmra.mxu0 %v2118_v12 }
 0x502   : > { %2384 = vmatpush.msrb.mxu3 %v3797_v3 }
 0x507   : > { %2152 = vmatmul.f32.gmra.mxu3 %v2117_v8  ;;  %2235 = vmatmul.f32.vlgmr.msra.gmra.mxu2 %v2109_v2 }
 0x508   : > { %2331 = vmatmul.f32.vlgmr.msrb.gmra.mxu1 %v2292_v27 }
 0x509   : > { %2297 = vmatmul.f32.vlgmr.msrb.gmra.mxu0 %v2296_v13 }
 0x50f   : > { %2239 = vmatmul.f32.gmra.mxu2 %v2117_v8  ;;  %2261 = vmatmul.f32.vlgmr.msra.gmra.mxu3 %v2109_v2 }
 0x510   : > { %2335 = vmatmul.f32.gmra.mxu1 %v2300_v38 }
 0x511   : > { %2305 = vmatmul.f32.gmra.mxu0 %v2304_v43 }
 0x517   : > { %2265 = vmatmul.f32.gmra.mxu3 %v2117_v8  ;;  %2359 = vmatmul.f32.vlgmr.msrb.gmra.mxu2 %v2293_v33 }
 0x518   : > { %2444 = vmatmul.f32.vlgmr.msra.gmra.mxu1 %v2292_v27 }
 0x519   : > { %2418 = vmatmul.f32.vlgmr.msra.gmra.mxu0 %v2292_v27 }
 0x51f   : > { %2364 = vmatmul.f32.gmra.mxu2 %v2301_v40  ;;  %2388 = vmatmul.f32.vlgmr.msrb.gmra.mxu3 %v2294_v37  ;;  %v2497_v40 = vsel %vm2495_vm5, %v2477_v39, 0 }
 0x520   : > { %2448 = vmatmul.f32.gmra.mxu1 %v2300_v38  ;;  %v3840_v13 = vand.u32 4294901760, %v2497_v40 }
 0x521   : > { %2422 = vmatmul.f32.gmra.mxu0 %v2300_v38  ;;  %v2907_v38 = vld [vmem:[%s3983_s16 + $0x8] sm:$0xff] }
 0x527   : > { %2394 = vmatmul.f32.gmra.mxu3 %v2302_v41  ;;  %v3373_v41 = vpop.permute.xlu0 %3372 }
 0x528   : > { %v3375_v42 = vunpack.i.h.bf16 %v3373_v41 }
 0x574   : > { %v2206_v28 = vpop.f32.mrf.mxu1 }
 0x576   : > { %v2177_v44 = vpop.f32.mrf.mxu0 }
 0x57a   : > { %v2115_v45 = vpop.f32.mrf.mxu2 }
 0x57d   : > { %v2212_v48 = vpop.f32.mrf.mxu1 }
 0x57e   : > { %v2182_v46 = vpop.f32.mrf.mxu0 }
 0x582   : > { %v2123_v17 = vpop.f32.mrf.mxu2  ;;  %v2149_v47 = vpop.f32.mrf.mxu3 }
 0x583   : > { %v2150_v51 = vadd.f32 %v2149_v47, %v2115_v45  ;;  %v2478_v45 = vld [vmem:[%s3980_s13 + $0x8] sm:$0xff] }
 0x585   : > { %v2332_v10 = vpop.f32.mrf.mxu1  ;;  %v2178_v53 = vadd.f32 %v2177_v44, %v2150_v51  ;;  %v2521_v44 = vsub.f32 %v2497_v40, %v3840_v13 }
 0x586   : > { %v2298_v52 = vpop.f32.mrf.mxu0 }
 0x587   : > { %v2207_v56 = vadd.f32 %v2206_v28, %v2178_v53 }
 0x58a   : > { %v2153_v49 = vpop.f32.mrf.mxu3  ;;  %v2236_v50 = vpop.f32.mrf.mxu2 }
 0x58b   : > { %v2154_v57 = vadd.f32 %v2153_v49, %v2123_v17  ;;  %v2237_v58 = vadd.f32 %v2236_v50, %v2207_v56  ;;  %v2500_v17 = vsel %vm2495_vm5, %v2478_v45, 0  ;;  %v2522_v49 = vand.u32 4294901760, %v2521_v44 }
 0x58c   : > { %v3374_v50 = vunpack.i.l.bf16 %v3373_v41 }
 0x58d   : > { %v2183_v60 = vadd.f32 %v2182_v46, %v2154_v57  ;;  %v2336_v62 = vpop.f32.mrf.mxu1  ;;  %v2523_v53 = vsub.f32 %v2521_v44, %v2522_v49 }
 0x58e   : > { %v2306_v59 = vpop.f32.mrf.mxu0 }
 0x58f   : > { %v2213_v63 = vadd.f32 %v2212_v48, %v2183_v60 }
 0x592   : > { %v2240_v54 = vpop.f32.mrf.mxu2  ;;  %v2262_v55 = vpop.f32.mrf.mxu3 }
 0x593   : > { %v2263_v61 = vadd.f32 %v2262_v55, %v2237_v58  ;;  %v2241_v0 = vadd.f32 %v2240_v54, %v2213_v63 }
 0x595   : > { %v2299_v1 = vadd.f32 %v2298_v52, %v2263_v61  ;;  %v2445_v12 = vpop.f32.mrf.mxu1  ;;  %v3854_v52 = vand.u32 4294901760, %v2500_v17 }
 0x596   : > { %v2419_v7 = vpop.f32.mrf.mxu0 }
 0x597   : > { %v2333_v4 = vadd.f32 %v2332_v10, %v2299_v1  ;;  %v2529_v58 = vsub.f32 %v2500_v17, %v3854_v52 }
 0x59a   : > { %v2266_v16 = vpop.f32.mrf.mxu3  ;;  %v2360_v2 = vpop.f32.mrf.mxu2 }
 0x59b   : > { %v2267_v5 = vadd.f32 %v2266_v16, %v2241_v0  ;;  %v2361_v8 = vadd.f32 %v2360_v2, %v2333_v4  ;;  %v2530_v0 = vand.u32 4294901760, %v2529_v58 }
 0x59d   : > { %v2307_v14 = vadd.f32 %v2306_v59, %v2267_v5  ;;  %v2449_v31 = vpop.f32.mrf.mxu1  ;;  %v3300_v59 = vld [vmem:[%s3980_s13 + $0x10] sm:$0xff] }
 0x59e   : > { %v2423_v27 = vpop.f32.mrf.mxu0  ;;  %v2693_v1 = vsel %vm2495_vm5, %v3300_v59, 0 }
 0x59f   : > { %v2337_v20 = vadd.f32 %v2336_v62, %v2307_v14  ;;  %v2524_v62 = vand.u32 4294901760, %v2523_v53  ;;  %v2531_v14 = vsub.f32 %v2529_v58, %v2530_v0 }
 0x5a2   : > { %v2389_v11 = vpop.f32.mrf.mxu3  ;;  %v2365_v19 = vpop.f32.mrf.mxu2 }
 0x5a3   : > { %v2390_v15 = vadd.f32 %v2389_v11, %v2361_v8  ;;  %v2366_v23 = vadd.f32 %v2365_v19, %v2337_v20  ;;  %v3862_v8 = vand.u32 4294901760, %v2693_v1 }
 0x5a5   : > { %v2420_v18 = vadd.f32 %v2419_v7, %v2390_v15  ;;  %v3301_v15 = vld [vmem:[%s3980_s13 + $0x18] sm:$0xff]  ;;  %v2717_v20 = vsub.f32 %v2693_v1, %v3862_v8 }
 0x5a7   : > { %v2446_v21 = vadd.f32 %v2445_v12, %v2420_v18 }
 0x5a9   : > { %v2464_v24 = vadd.f32 %v2457_v22, %v2446_v21  ;;  %v2696_v21 = vsel %vm2495_vm5, %v3301_v15, 0  ;;  %v2532_v22 = vand.u32 4294901760, %v2531_v14 }
 0x5aa   : > { %v2395_v26 = vpop.f32.mrf.mxu3 }
 0x5ab   : > { %v2466_v29 = vmax.f32 %v2464_v24, 0.0  ;;  %v2396_v30 = vadd.f32 %v2395_v26, %v2366_v23  ;;  %v2718_v24 = vand.u32 4294901760, %v2717_v20  ;;  %v2724_v26 = vand.u32 4294901760, %v2696_v21 }
 0x5ad   : > { %2471 = vst [vmem:[#allocation2 + $0x18] sm:$0xff] %v2466_v29  ;;  %v2424_v32 = vadd.f32 %v2423_v27, %v2396_v30  ;;  %2485 = vrot.lane.b32.xlu2 %v2466_v29, %s4032_s25  ;;  %v3848_v46 = vand.u32 4294901760, %v2466_v29  ;;  %v2719_v27 = vsub.f32 %v2717_v20, %v2718_v24 }
 0x5af   : > { %v2450_v33 = vadd.f32 %v2449_v31, %v2424_v32  ;;  %v2754_v51 = vsub.f32 %v2466_v29, %v3848_v46  ;;  %v2725_v29 = vsub.f32 %v2696_v21, %v2724_v26  ;;  %v2720_v30 = vand.u32 4294901760, %v2719_v27 }
 0x5b1   : > { %v2465_v35 = vadd.f32 %v2462_v34, %v2450_v33  ;;  %v2755_v57 = vand.u32 4294901760, %v2754_v51  ;;  %v2726_v31 = vand.u32 4294901760, %v2725_v29  ;;  %v2904_v34 = vld [vmem:[%s3982_s15] sm:$0xff] }
 0x5b3   : > { %v2467_v37 = vmax.f32 %v2465_v35, 0.0  ;;  %v2756_v2 = vsub.f32 %v2754_v51, %v2755_v57  ;;  %v2727_v32 = vsub.f32 %v2725_v29, %v2726_v31  ;;  %v2919_v35 = vsel %vm960_vm3, %v2904_v34, 0 }
 0x5b5   : > { %2489 = vrot.lane.b32.xlu1 %v2467_v37, %s4032_s25  ;;  %2892 = vperm.xlu2 %3369, %v2888_v36   ;;  %v3842_v43 = vand.u32 4294901760, %v2467_v37  ;;  %v2757_v12 = vand.u32 4294901760, %v2756_v2  ;;  %v2728_v33 = vand.u32 4294901760, %v2727_v32  ;;  %v2941_v36 = vand.u32 4294901760, %v2919_v35 }
 0x5b7   : > { %v2748_v47 = vsub.f32 %v2467_v37, %v3842_v43  ;;  %v2942_v37 = vsub.f32 %v2919_v35, %v2941_v36 }
 0x5b9   : > { %v2749_v54 = vand.u32 4294901760, %v2748_v47 }
 0x5bb   : > { %v2750_v16 = vsub.f32 %v2748_v47, %v2749_v54 }
 0x5bd   : > { %2915 = vperm.xlu1 %3368, %v2907_v38   ;;  %v2751_v7 = vand.u32 4294901760, %v2750_v16 }
 0x607   : > { %v2486_v28 = vpop.permute.xlu2 %2485 }
 0x608   : > { %v2491_v48 = vsel %vm633_vm0, %v3375_v42, %v2486_v28 }
 0x609   : > { %v2518_v10 = vand.u32 4294901760, %v2491_v48 }
 0x60b   : > { %v2558_v60 = vsub.f32 %v2491_v48, %v2518_v10 }
 0x60d   : > { %v2559_v5 = vand.u32 4294901760, %v2558_v60 }
 0x60f   : > { %v2560_v19 = vsub.f32 %v2558_v60, %v2559_v5 }
 0x611   : > { %v2561_v23 = vand.u32 4294901760, %v2560_v19 }
 0x627   : > { %v2490_v55 = vpop.permute.xlu1 %2489 }
 0x628   : > { %v2492_v56 = vsel %vm633_vm0, %v3374_v50, %v2490_v55 }
 0x629   : > { %v2516_v61 = vand.u32 4294901760, %v2492_v56 }
 0x62b   : > { %v2552_v63 = vsub.f32 %v2492_v56, %v2516_v61  ;;  %2517 = vmatpush.msra.mxu2 %v2516_v61  ;;  %2618 = vmatpush.msrb.mxu1 %v2516_v61 }
 0x62d   : > { %v2553_v4 = vand.u32 4294901760, %v2552_v63  ;;  %2519 = vmatpush.msra.mxu2 %v2518_v10  ;;  %2588 = vmatpush.msrb.mxu0 %v2552_v63 }
 0x62e   : > { %2620 = vmatpush.msrb.mxu1 %v2518_v10  ;;  %2525 = vmatmul.f32.vlgmr.msra.gmra.mxu2 %v2524_v62 }
 0x62f   : > { %v2554_v11 = vsub.f32 %v2552_v63, %v2553_v4  ;;  %2624 = vmatmul.f32.vlgmr.msrb.gmra.mxu1 %v2522_v49  ;;  %2591 = vmatpush.msrb.mxu0 %v2558_v60 }
 0x630   : > { %2752 = vmatpush.msra.mxu1 %v2751_v7  ;;  %2651 = vmatpush.msrb.mxu2 %v2553_v4 }
 0x631   : > { %2594 = vmatmul.f32.vlgmr.msrb.gmra.mxu0 %v2521_v44  ;;  %v2555_v18 = vand.u32 4294901760, %v2554_v11 }
 0x632   : > { %2713 = vmatpush.msra.mxu0 %v3842_v43  ;;  %2758 = vmatpush.msra.mxu1 %v2757_v12 }
 0x633   : > { %2655 = vmatpush.msrb.mxu2 %v2559_v5  ;;  %2556 = vmatpush.msra.mxu3 %v2555_v18 }
 0x634   : > { %2876 = vmatpush.msrb.mxu1 %v3842_v43  ;;  %2715 = vmatpush.msra.mxu0 %v3848_v46 }
 0x635   : > { %2784 = vmatpush.msra.mxu2 %v2748_v47  ;;  %2562 = vmatpush.msra.mxu3 %v2561_v23 }
 0x636   : > { %2847 = vmatpush.msrb.mxu0 %v2749_v54  ;;  %2878 = vmatpush.msrb.mxu1 %v3848_v46 }
 0x637   : > { %2787 = vmatpush.msra.mxu2 %v2754_v51  ;;  %2564 = vmatmul.f32.vlgmr.msra.gmra.mxu3 %v3840_v13 }
 0x638   : > { %2851 = vmatpush.msrb.mxu0 %v2755_v57  ;;  %2533 = vmatmul.f32.gmra.mxu2 %v2532_v22 }
 0x639   : > { %2630 = vmatmul.f32.gmra.mxu1 %v2530_v0  ;;  %2680 = vmatpush.msrb.mxu3 %v2516_v61 }
 0x63a   : > { %2599 = vmatmul.f32.gmra.mxu0 %v2529_v58 }
 0x63b   : > { %2682 = vmatpush.msrb.mxu3 %v2518_v10 }
 0x63d   : > { %2814 = vmatpush.msra.mxu3 %v3842_v43 }
 0x63f   : > { %2816 = vmatpush.msra.mxu3 %v3848_v46 }
 0x640   : > { %2568 = vmatmul.f32.gmra.mxu3 %v3854_v52  ;;  %2657 = vmatmul.f32.vlgmr.msrb.gmra.mxu2 %v3840_v13 }
 0x641   : > { %2760 = vmatmul.f32.vlgmr.msra.gmra.mxu1 %v3862_v8  ;;  %2940 = vmatpush.msrb.mxu2 %v3797_v3 }
 0x642   : > { %3033 = vmatpush.msra.mxu1 %v3797_v3  ;;  %2721 = vmatmul.f32.vlgmr.msra.gmra.mxu0 %v2720_v30 }
 0x643   : > { %3005 = vmatpush.msra.mxu0 %v3804_v6  ;;  %v2905_v6 = vld [vmem:[%s3982_s15 + $0x8] sm:$0xff] }
 0x644   : > { %v2922_v38 = vsel %vm960_vm3, %v2905_v6, 0 }
 0x645   : > { %v2949_v39 = vand.u32 4294901760, %v2922_v38 }
 0x648   : > { %2661 = vmatmul.f32.gmra.mxu2 %v3854_v52  ;;  %2684 = vmatmul.f32.vlgmr.msrb.gmra.mxu3 %v3840_v13  ;;  %v2950_v13 = vsub.f32 %v2922_v38, %v2949_v39 }
 0x649   : > { %2978 = vmatpush.msrb.mxu3 %v3816_v25  ;;  %2764 = vmatmul.f32.gmra.mxu1 %v2724_v26  ;;  %v2943_v25 = vand.u32 4294901760, %v2942_v37 }
 0x64a   : > { %2729 = vmatmul.f32.gmra.mxu0 %v2728_v33  ;;  %v2951_v42 = vand.u32 4294901760, %v2950_v13 }
 0x64b   : > { %v2944_v40 = vsub.f32 %v2942_v37, %v2943_v25 }
 0x64d   : > { %v2945_v41 = vand.u32 4294901760, %v2944_v40 }
 0x650   : > { %2688 = vmatmul.f32.gmra.mxu3 %v3854_v52  ;;  %2790 = vmatmul.f32.vlgmr.msra.gmra.mxu2 %v2717_v20 }
 0x651   : > { %3065 = vmatpush.msra.mxu2 %v3807_v9  ;;  %2880 = vmatmul.f32.vlgmr.msrb.gmra.mxu1 %v3862_v8  ;;  %v2952_v9 = vsub.f32 %v2950_v13, %v2951_v42 }
 0x652   : > { %2853 = vmatmul.f32.vlgmr.msrb.gmra.mxu0 %v3862_v8 }
 0x653   : > { %v2953_v43 = vand.u32 4294901760, %v2952_v9 }
 0x658   : > { %2795 = vmatmul.f32.gmra.mxu2 %v2725_v29  ;;  %2820 = vmatmul.f32.vlgmr.msra.gmra.mxu3 %v2718_v24 }
 0x659   : > { %3091 = vmatpush.msra.mxu3 %v3797_v3  ;;  %2884 = vmatmul.f32.gmra.mxu1 %v2724_v26 }
 0x65a   : > { %2857 = vmatmul.f32.gmra.mxu0 %v2724_v26 }
 0x660   : > { %2826 = vmatmul.f32.gmra.mxu3 %v2726_v31  ;;  %2946 = vmatmul.f32.vlgmr.msrb.gmra.mxu2 %v2945_v41 }
 0x661   : > { %3037 = vmatmul.f32.vlgmr.msra.gmra.mxu1 %v2943_v25 }
 0x662   : > { %3008 = vmatmul.f32.vlgmr.msra.gmra.mxu0 %v2942_v37 }
 0x668   : > { %2954 = vmatmul.f32.gmra.mxu2 %v2953_v43  ;;  %2980 = vmatmul.f32.vlgmr.msrb.gmra.mxu3 %v2941_v36 }
 0x669   : > { %3043 = vmatmul.f32.gmra.mxu1 %v2951_v42 }
 0x66a   : > { %3013 = vmatmul.f32.gmra.mxu0 %v2950_v13 }
 0x670   : > { %2984 = vmatmul.f32.gmra.mxu3 %v2949_v39  ;;  %3067 = vmatmul.f32.vlgmr.msra.gmra.mxu2 %v2941_v36 }
 0x678   : > { %3071 = vmatmul.f32.gmra.mxu2 %v2949_v39  ;;  %3093 = vmatmul.f32.vlgmr.msra.gmra.mxu3 %v2941_v36 }
 0x680   : > { %3097 = vmatmul.f32.gmra.mxu3 %v2949_v39 }
 0x681   : > { %3403 = shalt.err (!%p3400_p3)
}
 0x682   : > { %3313 = dma.vmem_to_hbm [thread:$0]  (%p3647_p5), %s3145_s20, 128, %s3147_s26, %s3907_s9  }
 0x683   : > { %s3130_s7 = sshll.u32 %s3746_s28, 4  ;;  %s3132_s2 = sshll.u32 %s3128_s8, 4  ;;  %s3131_s7 = int_to_ptr.vmem [resolvable:$true] %s3130_s7  ;;  %s3133_s2 = int_to_ptr.hbm [resolvable:$true] %s3132_s2 }
 0x684   : > { %s3108_s6 = scalar_lea.sflag [#allocation4], %s3737_s27  ;;  %s3418_s25 = sshra.s32 %s3133_s2, 4  ;;  %s3419_s25 = int_to_ptr.hbm [resolvable:$true] %s3418_s25 }
 0x685   : > { %s3420_s12 = scalar_lea.hbm %s3419_s25, 8  ;;  %s3424_s29 = scalar_lea.hbm %s3984_s17, 16 }
 0x686   : > { %p3421_p4 = scmp.ne.s32.totalorder %s3419_s25, %s3420_s12  ;;  %p3425_p9 = scmp.lt.s32.totalorder %s3419_s25, %s3984_s17 }
 0x687   : > { %p3426_p10 = scmp.lt.s32.totalorder %s3424_s29, %s3420_s12 }
 0x688   : > { %p3422_p7 = pnand %p3421_p4, %p3647_p5 }
 0x689   : > { %p3427_p11 = por %p3426_p10, %p3425_p9 }
 0x68a   : > { %p3423_p8 = pneg %p3422_p7 }
 0x68c   : > { %p3428_p12 = pnand %p3427_p11, %p3423_p8 }
 0x68e   : > { %3431 = shalt.err (!%p3428_p12)
}
 0x68f   : > { %3312 = dma.vmem_to_hbm [thread:$0]  (%p3647_p5), %s3131_s7, 128, %s3133_s2, %s3108_s6   ;;  %v2911_v24 = vpop.permute.xlu0 %2910  ;;  %v2916_v37 = vpop.permute.xlu1 %2915 }
 0x690   : > { %v2893_v39 = vpop.permute.xlu2 %2892  ;;  %s3292_s8 = sshll.u32 %s3737_s27, 4  ;;  %s3311_s28 = sshll.u32 %s3628_s1, 4 }
 0x691   : > { %s611_s20 = scalar_lea.vmem [#allocation7], %s3292_s8  ;;  %s3157_s7 = scalar_lea.hbm %s3986_s19, %s3311_s28 }
 0x692   : > { %s3158_s27 = sshll.u32 %s611_s20, 4  ;;  %s3160_s2 = sshll.u32 %s3157_s7, 4  ;;  %s3159_s27 = int_to_ptr.vmem [resolvable:$true] %s3158_s27  ;;  %s3161_s2 = int_to_ptr.hbm [resolvable:$true] %s3160_s2 }
 0x693   : > { %s3446_s1 = sshra.s32 %s3161_s2, 4  ;;  %s3452_s10 = scalar_lea.hbm %s3986_s19, 32  ;;  %s3447_s1 = int_to_ptr.hbm [resolvable:$true] %s3446_s1 }
 0x694   : > { %s3448_s6 = scalar_lea.hbm %s3447_s1, 16  ;;  %p3453_p2 = scmp.lt.s32.totalorder %s3447_s1, %s3986_s19 }
 0x695   : > { %p3449_p13 = scmp.ne.s32.totalorder %s3447_s1, %s3448_s6  ;;  %p3454_p3 = scmp.lt.s32.totalorder %s3452_s10, %s3448_s6 }
 0x697   : > { %p3450_p0 = pnand %p3449_p13, %p3647_p5  ;;  %p3455_p4 = por %p3454_p3, %p3453_p2 }
 0x699   : > { %p3451_p1 = pneg %p3450_p0 }
 0x69b   : > { %p3456_p7 = pnand %p3455_p4, %p3451_p1 }
 0x6ac   : > { %v2625_v45 = vpop.f32.mrf.mxu1 }
 0x6ae   : > { %v2595_v44 = vpop.f32.mrf.mxu0 }
 0x6b1   : > { %v2526_v3 = vpop.f32.mrf.mxu2 }
 0x6b6   : > { %v2631_v47 = vpop.f32.mrf.mxu1 }
 0x6b7   : > { %v2600_v17 = vpop.f32.mrf.mxu0 }
 0x6ba   : > { %v2565_v46 = vpop.f32.mrf.mxu3 }
 0x6bb   : > { %v2534_v28 = vpop.f32.mrf.mxu2  ;;  %v2566_v56 = vadd.f32 %v2565_v46, %v2526_v3 }
 0x6bd   : > { %v2596_v58 = vadd.f32 %v2595_v44, %v2566_v56 }
 0x6be   : > { %v2761_v51 = vpop.f32.mrf.mxu1 }
 0x6bf   : > { %v2722_v50 = vpop.f32.mrf.mxu0  ;;  %v2626_v62 = vadd.f32 %v2625_v45, %v2596_v58 }
 0x6c3   : > { %v2569_v48 = vpop.f32.mrf.mxu3  ;;  %v2658_v49 = vpop.f32.mrf.mxu2 }
 0x6c4   : > { %v2570_v16 = vadd.f32 %v2569_v48, %v2534_v28  ;;  %v2659_v63 = vadd.f32 %v2658_v49, %v2626_v62  ;;  %v2898_v48 = vpop.permute.xlu0 %2897 }
 0x6c6   : > { %v2765_v57 = vpop.f32.mrf.mxu1  ;;  %v2601_v2 = vadd.f32 %v2600_v17, %v2570_v16 }
 0x6c7   : > { %v2730_v53 = vpop.f32.mrf.mxu0 }
 0x6c8   : > { %v2632_v7 = vadd.f32 %v2631_v47, %v2601_v2 }
 0x6cb   : > { %v2662_v52 = vpop.f32.mrf.mxu2  ;;  %v2685_v10 = vpop.f32.mrf.mxu3 }
 0x6cc   : > { %v2686_v0 = vadd.f32 %v2685_v10, %v2659_v63  ;;  %v2663_v12 = vadd.f32 %v2662_v52, %v2632_v7 }
 0x6ce   : > { %v2881_v1 = vpop.f32.mrf.mxu1  ;;  %v2723_v8 = vadd.f32 %v2722_v50, %v2686_v0 }
 0x6cf   : > { %v2854_v59 = vpop.f32.mrf.mxu0 }
 0x6d0   : > { %v2762_v14 = vadd.f32 %v2761_v51, %v2723_v8 }
 0x6d3   : > { %v2689_v54 = vpop.f32.mrf.mxu3  ;;  %v2791_v55 = vpop.f32.mrf.mxu2 }
 0x6d4   : > { %v2690_v15 = vadd.f32 %v2689_v54, %v2663_v12  ;;  %v2792_v19 = vadd.f32 %v2791_v55, %v2762_v14 }
 0x6d6   : > { %v2885_v18 = vpop.f32.mrf.mxu1  ;;  %v2731_v22 = vadd.f32 %v2730_v53, %v2690_v15 }
 0x6d7   : > { %v2858_v11 = vpop.f32.mrf.mxu0 }
 0x6d8   : > { %v2766_v29 = vadd.f32 %v2765_v57, %v2731_v22 }
 0x6db   : > { %v2796_v60 = vpop.f32.mrf.mxu2  ;;  %v2821_v61 = vpop.f32.mrf.mxu3 }
 0x6dc   : > { %v2822_v23 = vadd.f32 %v2821_v61, %v2792_v19  ;;  %v2797_v32 = vadd.f32 %v2796_v60, %v2766_v29 }
 0x6de   : > { %v2855_v30 = vadd.f32 %v2854_v59, %v2822_v23  ;;  %v3038_v33 = vpop.f32.mrf.mxu1 }
 0x6df   : > { %v3009_v27 = vpop.f32.mrf.mxu0 }
 0x6e0   : > { %v2882_v35 = vadd.f32 %v2881_v1, %v2855_v30 }
 0x6e2   : > { %v2900_v40 = vadd.f32 %v2893_v39, %v2882_v35 }
 0x6e3   : > { %v2827_v4 = vpop.f32.mrf.mxu3  ;;  %v2947_v5 = vpop.f32.mrf.mxu2 }
 0x6e4   : > { %v2948_v26 = vadd.f32 %v2947_v5, %v2911_v24  ;;  %v2828_v36 = vadd.f32 %v2827_v4, %v2797_v32  ;;  %v2902_v44 = vmax.f32 %v2900_v40, 0.0 }
 0x6e6   : > { %v2859_v13 = vadd.f32 %v2858_v11, %v2828_v36  ;;  %v3044_v17 = vpop.f32.mrf.mxu1 }
 0x6e7   : > { %v3014_v9 = vpop.f32.mrf.mxu0 }
 0x6e8   : > { %v2886_v45 = vadd.f32 %v2885_v18, %v2859_v13 }
 0x6ea   : > { %v2901_v50 = vadd.f32 %v2898_v48, %v2886_v45 }
 0x6eb   : > { %v2955_v20 = vpop.f32.mrf.mxu2  ;;  %v2981_v21 = vpop.f32.mrf.mxu3 }
 0x6ec   : > { %v2982_v31 = vadd.f32 %v2981_v21, %v2948_v26  ;;  %v2956_v25 = vadd.f32 %v2955_v20, %v2916_v37  ;;  %v2903_v54 = vmax.f32 %v2901_v50, 0.0 }
 0x6ee   : > { %v3010_v6 = vadd.f32 %v3009_v27, %v2982_v31 }
 0x6f0   : > { %v3039_v41 = vadd.f32 %v3038_v33, %v3010_v6 }
 0x6f3   : > { %v2985_v34 = vpop.f32.mrf.mxu3  ;;  %v3068_v38 = vpop.f32.mrf.mxu2 }
 0x6f4   : > { %v2986_v42 = vadd.f32 %v2985_v34, %v2956_v25  ;;  %v3069_v43 = vadd.f32 %v3068_v38, %v3039_v41 }
 0x6f6   : > { %v3015_v28 = vadd.f32 %v3014_v9, %v2986_v42 }
 0x6f8   : > { %v3045_v51 = vadd.f32 %v3044_v17, %v3015_v28 }
 0x6fb   : > { %v3094_v3 = vpop.f32.mrf.mxu3  ;;  %v3072_v49 = vpop.f32.mrf.mxu2 }
 0x6fc   : > { %v3095_v46 = vadd.f32 %v3094_v3, %v3069_v43  ;;  %v3073_v10 = vadd.f32 %v3072_v49, %v3045_v51 }
 0x6fe   : > { %v3101_v47 = vadd.f32 %v3095_v46, %v2902_v44 }
 0x700   : > { %v3103_v52 = vmax.f32 %v3101_v47, 0.0 }
 0x702   : > { %3105 = vst [vmem:[%s611_s20] sm:$0xff] %v3103_v52 }
 0x703   : > { %v3098_v53 = vpop.f32.mrf.mxu3 }
 0x704   : > { %v3099_v55 = vadd.f32 %v3098_v53, %v3073_v10 }
 0x706   : > { %v3102_v56 = vadd.f32 %v3099_v55, %v2903_v54 }
 0x708   : > { %v3104_v57 = vmax.f32 %v3102_v56, 0.0 }
 0x70a   : > { %3106 = vst [vmem:[%s611_s20 + $0x8] sm:$0xff] %v3104_v57 }
 0x70b   : > { %3459 = shalt.err (!%p3456_p7)
}
 0x70c   : > { %s3505_s24 = smov 128   ;;  %s3506_s4 = smov 8  }
 0x70d   : > { %3314 = dma.vmem_to_hbm [thread:$0]  (%p3647_p5), %s3159_s27, 256, %s3161_s2, %s3907_s9, %s3505_s24, %s3505_s24, %s3506_s4  }
 0x70e PF: > { %p3328_p8 = scmp.ge.s32.totalorder %s3498_s21, 2  ;;  %s3175_s28 = sand.u32 1, %s3486_s0  }
 0x70f   : > { %s3176_s20 = scalar_lea.sflag [#allocation4], %s3175_s28 }
 0x710   : > { %p3319_p9 = pnand %p3328_p8, %p3651_p6 }
 0x712   : > { %p3320_p10 = pneg %p3319_p9 }
 0x714   : > { %3477 = dma.done.wait (%p3320_p10), %s3176_s20, 128  }
 0x715   : > { %3479 = vsyncadd (%p3320_p10), %s3176_s20, 4294967168  ;;  %s4034_s26 = sadd.s32 4294967294, %s3498_s21  }
 0x716   : > { %s3185_s5 = sand.u32 1, %s4034_s26  }
 0x717   : > { %s3186_s7 = scalar_lea.sflag [#allocation6], %s3185_s5 }
 0x718   : > { %3481 = dma.done.wait (%p3320_p10), %s3186_s7, 384  }
 0x719   : > { %3483 = vsyncadd (%p3320_p10), %s3186_s7, 4294966912  ;;  %s4035_s21 = sld [smem:[#allocation11_spill]]  ;;  %s4038_s0 = smov %s3490_s30 }
 0x71a   : > { %s4036_s9 = sld [smem:[#allocation10_spill]] }
 0x71b   : > { %s4037_s20 = sld [smem:[#allocation12_spill]] }
 0x71f   : > { %p33_p5 = scmp.ge.s32.totalorder %s4035_s21, 4  }
 0x720   : > { %s4039_s30 = smov %s4036_s9 }
 0x721   :  { %35 = sbr.rel (!%p33_p5) target bundleno = 19 (0x13), region = 161 }
 0x726   :  { %3202 = vsyncpa [#allocation4], 1 }
 0x727   :  { %3204 = vsyncpa [#allocation4 + $0x1], 1 }
 0x728   :  { %3205 = vsyncpa [#allocation6], 1 }
 0x729   :  { %3207 = vsyncpa [#allocation6 + $0x1], 1 }

</bundles_post_ra>
